<compile_context>
chip_gen: v7x
topology: tpu7x:2x2x1
jax: 0.10.0
libtpu: 0.0.40
codegen_flags: <defaults>
</compile_context>

<pallas_src>
import jax
import jax.numpy as jnp
from jax import lax
from jax.experimental import pallas as pl
from jax.experimental.pallas import tpu as pltpu


# ----------------------------------------------------------------------------
# Conv 3x3 (+ bias) with fused BN statistics
# ----------------------------------------------------------------------------
def _conv3x3_stats_kernel(xp_ref, w_ref, b_ref, o_ref, ssum_ref, ssq_ref):
    # xp_ref: (1, H+2, W+2, Cin) padded image, w_ref: (9, Cin, Cout),
    # b_ref: (1, Cout), o_ref: (1, H, W, Cout), ssum/ssq: (1, Cout) accumulators.
    _, _, _, cin = xp_ref.shape
    _, H, W, cout = o_ref.shape

    acc = jnp.zeros((H * W, cout), jnp.float32)
    for dh in range(3):
        for dw in range(3):
            k = dh * 3 + dw
            win = xp_ref[0, dh:dh + H, dw:dw + W, :].reshape(H * W, cin)
            wk = w_ref[k]                              # (Cin, Cout)
            if cin == 1:
                # degenerate K=1: broadcast outer product on the VPU
                acc = acc + win * wk
            else:
                acc = acc + jnp.dot(win.astype(jnp.bfloat16),
                                    wk.astype(jnp.bfloat16),
                                    preferred_element_type=jnp.float32)
    y = acc + b_ref[...]                               # (H*W, Cout) f32
    o_ref[...] = y.reshape(1, H, W, cout)

    # fused training-mode BN statistics, accumulated across the batch axis
    @pl.when(pl.program_id(0) == 0)
    def _init():
        ssum_ref[...] = jnp.zeros_like(ssum_ref)
        ssq_ref[...] = jnp.zeros_like(ssq_ref)

    ssum_ref[...] += jnp.sum(y, axis=0, keepdims=True)
    ssq_ref[...] += jnp.sum(y * y, axis=0, keepdims=True)


def _bn_relu_pool_kernel(y_ref, s_ref, b_ref, o_ref):
    # y_ref: (1, H, W, C); normalize + relu, then avg_pool2d(kernel=(2,1)).
    # If the output block is the padded shape (1, H//2+2, W+2, C) the zero
    # border for the next conv layer is produced in the same pass.
    _, H, W, C = y_ref.shape
    Hp = H // 2
    z = jnp.maximum(y_ref[...] * s_ref[...] + b_ref[...], 0.0)
    pooled = jnp.mean(z.reshape(1, Hp, 2, W, C), axis=2)         # (1, Hp, W, C)
    if o_ref.shape[1] == Hp:            # unpadded output (last conv block)
        o_ref[...] = pooled
    else:                               # zero-padded output for the next conv
        o_ref[...] = jnp.zeros_like(o_ref)
        o_ref[0, 1:Hp + 1, 1:W + 1, :] = pooled[0]


def conv_block(xp, w, b, gamma, beta, *, pad_output, eps=1e-5):
    """3x3 same conv -> training-mode BN -> ReLU -> avg_pool (2,1).  NHWC.

    `xp` is the already zero-padded input (B, H+2, W+2, Cin).  If
    `pad_output` the result is returned zero-padded for the next conv layer.
    """
    B, Hp2, Wp2, Cin = xp.shape
    H, W = Hp2 - 2, Wp2 - 2
    Cout = w.shape[-1]
    assert H % 2 == 0, "height must be even for the (2,1) pool"

    y, ssum, ssq = pl.pallas_call(
        _conv3x3_stats_kernel,
        out_shape=(
            jax.ShapeDtypeStruct((B, H, W, Cout), jnp.float32),
            jax.ShapeDtypeStruct((1, Cout), jnp.float32),
            jax.ShapeDtypeStruct((1, Cout), jnp.float32),
        ),
        grid=(B,),
        in_specs=[
            pl.BlockSpec((1, Hp2, Wp2, Cin), lambda bi: (bi, 0, 0, 0)),
            pl.BlockSpec((9, Cin, Cout), lambda bi: (0, 0, 0)),
            pl.BlockSpec((1, Cout), lambda bi: (0, 0)),
        ],
        out_specs=(
            pl.BlockSpec((1, H, W, Cout), lambda bi: (bi, 0, 0, 0)),
            pl.BlockSpec((1, Cout), lambda bi: (0, 0)),
            pl.BlockSpec((1, Cout), lambda bi: (0, 0)),
        ),
        compiler_params=pltpu.CompilerParams(
            dimension_semantics=("arbitrary",)),   # stats accumulate over batch
    )(xp, w, b.reshape(1, Cout))

    cnt = float(B * H * W)
    mean = ssum[0] / cnt
    var = jnp.maximum(ssq[0] / cnt - mean * mean, 0.0)   # biased, training-mode
    scale = gamma * lax.rsqrt(var + eps)
    bias = beta - mean * scale

    Hp = H // 2
    if pad_output:
        out_shape = (B, Hp + 2, W + 2, Cout)
    else:
        out_shape = (B, Hp, W, Cout)
    oh, ow = out_shape[1], out_shape[2]

    return pl.pallas_call(
        _bn_relu_pool_kernel,
        out_shape=jax.ShapeDtypeStruct(out_shape, jnp.float32),
        grid=(B,),
        in_specs=[
            pl.BlockSpec((1, H, W, Cout), lambda bi: (bi, 0, 0, 0)),
            pl.BlockSpec((1, 1, 1, Cout), lambda bi: (0, 0, 0, 0)),
            pl.BlockSpec((1, 1, 1, Cout), lambda bi: (0, 0, 0, 0)),
        ],
        out_specs=pl.BlockSpec((1, oh, ow, Cout), lambda bi: (bi, 0, 0, 0)),
        compiler_params=pltpu.CompilerParams(
            dimension_semantics=("parallel",)),
    )(y, scale.reshape(1, 1, 1, Cout), bias.reshape(1, 1, 1, Cout))


# ----------------------------------------------------------------------------
# Generic M-tiled matmul + bias (bf16 MXU operands, f32 accumulation)
# ----------------------------------------------------------------------------
def _matmul_bias_kernel(x_ref, w_ref, b_ref, o_ref):
    o_ref[...] = jnp.dot(x_ref[...].astype(jnp.bfloat16),
                         w_ref[...].astype(jnp.bfloat16),
                         preferred_element_type=jnp.float32) + b_ref[...]


def matmul_bias(x, w, b, tile_m=512):
    M, K = x.shape
    N = w.shape[1]
    tm = tile_m if (M > tile_m and M % tile_m == 0) else M
    return pl.pallas_call(
        _matmul_bias_kernel,
        out_shape=jax.ShapeDtypeStruct((M, N), jnp.float32),
        grid=(M // tm,),
        in_specs=[
            pl.BlockSpec((tm, K), lambda i: (i, 0)),
            pl.BlockSpec((K, N), lambda i: (0, 0)),
            pl.BlockSpec((1, N), lambda i: (0, 0)),
        ],
        out_specs=pl.BlockSpec((tm, N), lambda i: (i, 0)),
        compiler_params=pltpu.CompilerParams(
            dimension_semantics=("parallel",)),
    )(x, w, b.reshape(1, N))


# ----------------------------------------------------------------------------
# Fused bidirectional GRU recurrence (input projection precomputed)
# ----------------------------------------------------------------------------
def _bigru_rec_kernel(gi_ref, whh_ref, bhh_ref, o_ref, h_sc):
    # gi_ref : (T, B, 6H)  -> [:, :, :3H] fwd gates r|z|n, [:, :, 3H:] bwd gates
    # whh_ref: (2, H, 3H), bhh_ref: (2, 1, 3H)
    # o_ref  : (T, B, 2H)  -> [:, :, :H] forward, [:, :, H:] backward
    # h_sc   : (2, B, H)   hidden state for both directions
    T, _, _ = gi_ref.shape
    H = whh_ref.shape[1]
    h_sc[...] = jnp.zeros_like(h_sc)

    def step(t, carry):
        for d in range(2):                         # 0 = forward, 1 = backward
            ti = t if d == 0 else T - 1 - t
            gi = gi_ref[ti][:, d * 3 * H:(d + 1) * 3 * H]          # (B, 3H)
            h = h_sc[d]                                            # (B, H)
            gh = jnp.dot(h, whh_ref[d],
                         preferred_element_type=jnp.float32) + bhh_ref[d]
            r = jax.nn.sigmoid(gi[:, :H] + gh[:, :H])
            z = jax.nn.sigmoid(gi[:, H:2 * H] + gh[:, H:2 * H])
            n = jnp.tanh(gi[:, 2 * H:] + r * gh[:, 2 * H:])
            h_new = (1.0 - z) * n + z * h
            h_sc[d] = h_new
            o_ref[ti, :, d * H:(d + 1) * H] = h_new
        return carry

    lax.fori_loop(0, T, step, 0, unroll=True)


def gru_recurrence(gi, whh, bhh, hidden):
    T, B, _ = gi.shape
    return pl.pallas_call(
        _bigru_rec_kernel,
        out_shape=jax.ShapeDtypeStruct((T, B, 2 * hidden), jnp.float32),
        grid=(1,),
        in_specs=[
            pl.BlockSpec((T, B, 6 * hidden), lambda i: (0, 0, 0)),
            pl.BlockSpec((2, hidden, 3 * hidden), lambda i: (0, 0, 0)),
            pl.BlockSpec((2, 1, 3 * hidden), lambda i: (0, 0, 0)),
        ],
        out_specs=pl.BlockSpec((T, B, 2 * hidden), lambda i: (0, 0, 0)),
        scratch_shapes=[pltpu.VMEM((2, B, hidden), jnp.float32)],
    )(gi, whh, bhh)


def bigru(x_btd, gru_params, hidden):
    """batch_first bidirectional multi-layer GRU, torch semantics; (B,T,2H)."""
    x = jnp.transpose(x_btd, (1, 0, 2))            # (T, B, D)
    T, B, _ = x.shape
    for p in gru_params:
        D = x.shape[-1]
        # Hoisted input projection for all timesteps and BOTH directions at once.
        gi = matmul_bias(x.reshape(T * B, D), p["wih"], p["bih"])
        gi = gi.reshape(T, B, 6 * hidden)
        x = gru_recurrence(gi, p["whh"], p["bhh"], hidden)          # (T, B, 2H)
    return jnp.transpose(x, (1, 0, 2))


# ----------------------------------------------------------------------------
# Final Linear + sigmoid
# ----------------------------------------------------------------------------
def _fc_sigmoid_kernel(x_ref, w_ref, b_ref, o_ref):
    y = jnp.dot(x_ref[0], w_ref[...],
                preferred_element_type=jnp.float32) + b_ref[...]
    o_ref[0] = jax.nn.sigmoid(y)


def fc_sigmoid(x_btd, w, b):
    B, T, D = x_btd.shape
    N = w.shape[1]
    # TODO(synk): n_class < 128 lanes -> masked stores; padding to a 128-lane
    # scratch is skipped at these tiny sizes.
    return pl.pallas_call(
        _fc_sigmoid_kernel,
        out_shape=jax.ShapeDtypeStruct((B, T, N), jnp.float32),
        grid=(B,),
        in_specs=[
            pl.BlockSpec((1, T, D), lambda i: (i, 0, 0)),
            pl.BlockSpec((D, N), lambda i: (0, 0)),
            pl.BlockSpec((1, N), lambda i: (0, 0)),
        ],
        out_specs=pl.BlockSpec((1, T, N), lambda i: (i, 0, 0)),
        compiler_params=pltpu.CompilerParams(
            dimension_semantics=("parallel",)),
    )(x_btd, w, b.reshape(1, N))


# ----------------------------------------------------------------------------
# Full forward pass
# ----------------------------------------------------------------------------
def crnn_forward(x_nchw, conv_params, gru_params, fc_w, fc_b, hidden):
    x = jnp.transpose(x_nchw, (0, 2, 3, 1)).astype(jnp.float32)   # NCHW -> NHWC
    xp = jnp.pad(x, ((0, 0), (1, 1), (1, 1), (0, 0)))   # only the raw input
    n_blocks = len(conv_params)
    for i, (w, b, g, be) in enumerate(conv_params):
        # intermediate layers return an already zero-padded map for the next conv
        xp = conv_block(xp, w, b, g, be, pad_output=(i < n_blocks - 1))
    B, Hh, W, C = xp.shape
    # torch: permute(0,3,1,2).view(b, w, c*h) -> feature index = c*Hh + h
    seq = jnp.transpose(xp, (0, 2, 3, 1)).reshape(B, W, C * Hh)
    rnn_out = bigru(seq, gru_params, hidden)                      # (B, W, 2H)
    return fc_sigmoid(rnn_out, fc_w, fc_b)                        # (B, W, n_class)


# ----------------------------------------------------------------------------
# Parameter initialization (torch-like)
# ----------------------------------------------------------------------------
def _uniform(key, shape, k):
    return jax.random.uniform(key, shape, jnp.float32, -k, k)


def init_params(key, gru_input_size, n_class, hidden, n_layers):
    conv_channels = [(1, 64), (64, 128), (128, 256), (256, 512)]
    conv_params = []
    for (cin, cout) in conv_channels:
        key, kw, kb = jax.random.split(key, 3)
        k = 1.0 / jnp.sqrt(cin * 9.0)
        w = _uniform(kw, (9, cin, cout), k)          # taps flattened as dh*3+dw
        b = _uniform(kb, (cout,), k)
        gamma = jnp.ones((cout,), jnp.float32)       # torch BatchNorm2d init
        beta = jnp.zeros((cout,), jnp.float32)
        conv_params.append((w, b, gamma, beta))

    gru_params = []
    kh = 1.0 / jnp.sqrt(float(hidden))
    for l in range(n_layers):
        din = gru_input_size if l == 0 else 2 * hidden
        key, k1, k2, k3, k4 = jax.random.split(key, 5)
        gru_params.append({
            # columns: [fwd r|z|n | bwd r|z|n]  -> one projection matmul/layer
            "wih": _uniform(k1, (din, 6 * hidden), kh),
            "bih": _uniform(k2, (6 * hidden,), kh),
            "whh": _uniform(k3, (2, hidden, 3 * hidden), kh),   # (dir, H, r|z|n)
            "bhh": _uniform(k4, (2, 1, 3 * hidden), kh),
        })

    key, kw, kb = jax.random.split(key, 3)
    kfc = 1.0 / jnp.sqrt(2.0 * hidden)
    fc_w = _uniform(kw, (2 * hidden, n_class), kfc)
    fc_b = _uniform(kb, (n_class,), kfc)
    return conv_params, gru_params, fc_w, fc_b


if __name__ == "__main__":
    key = jax.random.PRNGKey(0)
    B, Cin, H, W = 2, 1, 16, 8          # H/16 = 1 row left after the 4 pools
    n_class, hidden, n_layers = 16, 32, 2
    gru_input_size = 512 * (H // 16)    # channels * remaining height

    key, kx = jax.random.split(key)
    x = jax.random.normal(kx, (B, Cin, H, W), dtype=jnp.float32)

    conv_params, gru_params, fc_w, fc_b = init_params(
        key, gru_input_size, n_class, hidden, n_layers
    )

    out = crnn_forward(x, conv_params, gru_params, fc_w, fc_b, hidden)
    out = jax.block_until_ready(out)

    assert out.shape == (B, W, n_class), out.shape
    assert bool(jnp.all(jnp.isfinite(out)))
    assert bool(jnp.all((out >= 0.0) & (out <= 1.0)))
    print("KERNEL_OK")
</pallas_src>

<mosaic_0001>
module attributes {stable_mosaic.version = 11 : i64} {
  func.func @_conv3x3_stats_kernel(%arg0: i32, %arg1: memref<1x18x10x1xf32, #tpu.memory_space<vmem>>, %arg2: memref<9x1x64xf32, #tpu.memory_space<vmem>>, %arg3: memref<1x64xf32, #tpu.memory_space<vmem>>, %arg4: memref<1x16x8x64xf32, #tpu.memory_space<vmem>>, %arg5: memref<1x64xf32, #tpu.memory_space<vmem>>, %arg6: memref<1x64xf32, #tpu.memory_space<vmem>>) attributes {dimension_semantics = [#tpu.dimension_semantics<arbitrary>], iteration_bounds = array<i64: 2>, scalar_prefetch = 0 : i64, scratch_operands = 0 : i64, tpu.core_type = #tpu.core_type<tc>, window_params = [{transform_indices = @transform_0, window_bounds = array<i64: 1, 18, 10, 1>}, {pipeline_mode = #tpu.pipeline_mode<synchronous>, transform_indices = @transform_1, window_bounds = array<i64: 9, 1, 64>}, {pipeline_mode = #tpu.pipeline_mode<synchronous>, transform_indices = @transform_2, window_bounds = array<i64: 1, 64>}, {transform_indices = @transform_3, window_bounds = array<i64: 1, 16, 8, 64>}, {pipeline_mode = #tpu.pipeline_mode<synchronous>, transform_indices = @transform_4, window_bounds = array<i64: 1, 64>}, {pipeline_mode = #tpu.pipeline_mode<synchronous>, transform_indices = @transform_5, window_bounds = array<i64: 1, 64>}]} {
    %cst = arith.constant 0.000000e+00 : f32
    %0 = vector.broadcast %cst : f32 to vector<128x64xf32>
    %c0 = arith.constant 0 : index
    %c0_0 = arith.constant 0 : index
    %c0_1 = arith.constant 0 : index
    %c0_2 = arith.constant 0 : index
    %1 = vector.load %arg1[%c0, %c0_0, %c0_1, %c0_2] : memref<1x18x10x1xf32, #tpu.memory_space<vmem>>, vector<1x16x8x1xf32>
    %2 = vector.shape_cast %1 : vector<1x16x8x1xf32> to vector<16x8x1xf32>
    %3 = vector.shape_cast %2 : vector<16x8x1xf32> to vector<128x1xf32>
    %c0_3 = arith.constant 0 : index
    %c0_4 = arith.constant 0 : index
    %c0_5 = arith.constant 0 : index
    %4 = vector.load %arg2[%c0_3, %c0_4, %c0_5] : memref<9x1x64xf32, #tpu.memory_space<vmem>>, vector<1x1x64xf32>
    %5 = vector.shape_cast %4 : vector<1x1x64xf32> to vector<1x64xf32>
    %6 = vector.broadcast %3 : vector<128x1xf32> to vector<128x64xf32>
    %7 = vector.broadcast %5 : vector<1x64xf32> to vector<128x64xf32>
    %8 = arith.mulf %6, %7 : vector<128x64xf32>
    %9 = arith.addf %0, %8 : vector<128x64xf32>
    %c0_6 = arith.constant 0 : index
    %c0_7 = arith.constant 0 : index
    %c1 = arith.constant 1 : index
    %c0_8 = arith.constant 0 : index
    %10 = vector.load %arg1[%c0_6, %c0_7, %c1, %c0_8] : memref<1x18x10x1xf32, #tpu.memory_space<vmem>>, vector<1x16x8x1xf32>
    %11 = vector.shape_cast %10 : vector<1x16x8x1xf32> to vector<16x8x1xf32>
    %12 = vector.shape_cast %11 : vector<16x8x1xf32> to vector<128x1xf32>
    %c1_9 = arith.constant 1 : index
    %c0_10 = arith.constant 0 : index
    %c0_11 = arith.constant 0 : index
    %13 = vector.load %arg2[%c1_9, %c0_10, %c0_11] : memref<9x1x64xf32, #tpu.memory_space<vmem>>, vector<1x1x64xf32>
    %14 = vector.shape_cast %13 : vector<1x1x64xf32> to vector<1x64xf32>
    %15 = vector.broadcast %12 : vector<128x1xf32> to vector<128x64xf32>
    %16 = vector.broadcast %14 : vector<1x64xf32> to vector<128x64xf32>
    %17 = arith.mulf %15, %16 : vector<128x64xf32>
    %18 = arith.addf %9, %17 : vector<128x64xf32>
    %c0_12 = arith.constant 0 : index
    %c0_13 = arith.constant 0 : index
    %c2 = arith.constant 2 : index
    %c0_14 = arith.constant 0 : index
    %19 = vector.load %arg1[%c0_12, %c0_13, %c2, %c0_14] : memref<1x18x10x1xf32, #tpu.memory_space<vmem>>, vector<1x16x8x1xf32>
    %20 = vector.shape_cast %19 : vector<1x16x8x1xf32> to vector<16x8x1xf32>
    %21 = vector.shape_cast %20 : vector<16x8x1xf32> to vector<128x1xf32>
    %c2_15 = arith.constant 2 : index
    %c0_16 = arith.constant 0 : index
    %c0_17 = arith.constant 0 : index
    %22 = vector.load %arg2[%c2_15, %c0_16, %c0_17] : memref<9x1x64xf32, #tpu.memory_space<vmem>>, vector<1x1x64xf32>
    %23 = vector.shape_cast %22 : vector<1x1x64xf32> to vector<1x64xf32>
    %24 = vector.broadcast %21 : vector<128x1xf32> to vector<128x64xf32>
    %25 = vector.broadcast %23 : vector<1x64xf32> to vector<128x64xf32>
    %26 = arith.mulf %24, %25 : vector<128x64xf32>
    %27 = arith.addf %18, %26 : vector<128x64xf32>
    %c0_18 = arith.constant 0 : index
    %c1_19 = arith.constant 1 : index
    %c0_20 = arith.constant 0 : index
    %c0_21 = arith.constant 0 : index
    %28 = vector.load %arg1[%c0_18, %c1_19, %c0_20, %c0_21] : memref<1x18x10x1xf32, #tpu.memory_space<vmem>>, vector<1x16x8x1xf32>
    %29 = vector.shape_cast %28 : vector<1x16x8x1xf32> to vector<16x8x1xf32>
    %30 = vector.shape_cast %29 : vector<16x8x1xf32> to vector<128x1xf32>
    %c3 = arith.constant 3 : index
    %c0_22 = arith.constant 0 : index
    %c0_23 = arith.constant 0 : index
    %31 = vector.load %arg2[%c3, %c0_22, %c0_23] : memref<9x1x64xf32, #tpu.memory_space<vmem>>, vector<1x1x64xf32>
    %32 = vector.shape_cast %31 : vector<1x1x64xf32> to vector<1x64xf32>
    %33 = vector.broadcast %30 : vector<128x1xf32> to vector<128x64xf32>
    %34 = vector.broadcast %32 : vector<1x64xf32> to vector<128x64xf32>
    %35 = arith.mulf %33, %34 : vector<128x64xf32>
    %36 = arith.addf %27, %35 : vector<128x64xf32>
    %c0_24 = arith.constant 0 : index
    %c1_25 = arith.constant 1 : index
    %c1_26 = arith.constant 1 : index
    %c0_27 = arith.constant 0 : index
    %37 = vector.load %arg1[%c0_24, %c1_25, %c1_26, %c0_27] : memref<1x18x10x1xf32, #tpu.memory_space<vmem>>, vector<1x16x8x1xf32>
    %38 = vector.shape_cast %37 : vector<1x16x8x1xf32> to vector<16x8x1xf32>
    %39 = vector.shape_cast %38 : vector<16x8x1xf32> to vector<128x1xf32>
    %c4 = arith.constant 4 : index
    %c0_28 = arith.constant 0 : index
    %c0_29 = arith.constant 0 : index
    %40 = vector.load %arg2[%c4, %c0_28, %c0_29] : memref<9x1x64xf32, #tpu.memory_space<vmem>>, vector<1x1x64xf32>
    %41 = vector.shape_cast %40 : vector<1x1x64xf32> to vector<1x64xf32>
    %42 = vector.broadcast %39 : vector<128x1xf32> to vector<128x64xf32>
    %43 = vector.broadcast %41 : vector<1x64xf32> to vector<128x64xf32>
    %44 = arith.mulf %42, %43 : vector<128x64xf32>
    %45 = arith.addf %36, %44 : vector<128x64xf32>
    %c0_30 = arith.constant 0 : index
    %c1_31 = arith.constant 1 : index
    %c2_32 = arith.constant 2 : index
    %c0_33 = arith.constant 0 : index
    %46 = vector.load %arg1[%c0_30, %c1_31, %c2_32, %c0_33] : memref<1x18x10x1xf32, #tpu.memory_space<vmem>>, vector<1x16x8x1xf32>
    %47 = vector.shape_cast %46 : vector<1x16x8x1xf32> to vector<16x8x1xf32>
    %48 = vector.shape_cast %47 : vector<16x8x1xf32> to vector<128x1xf32>
    %c5 = arith.constant 5 : index
    %c0_34 = arith.constant 0 : index
    %c0_35 = arith.constant 0 : index
    %49 = vector.load %arg2[%c5, %c0_34, %c0_35] : memref<9x1x64xf32, #tpu.memory_space<vmem>>, vector<1x1x64xf32>
    %50 = vector.shape_cast %49 : vector<1x1x64xf32> to vector<1x64xf32>
    %51 = vector.broadcast %48 : vector<128x1xf32> to vector<128x64xf32>
    %52 = vector.broadcast %50 : vector<1x64xf32> to vector<128x64xf32>
    %53 = arith.mulf %51, %52 : vector<128x64xf32>
    %54 = arith.addf %45, %53 : vector<128x64xf32>
    %c0_36 = arith.constant 0 : index
    %c2_37 = arith.constant 2 : index
    %c0_38 = arith.constant 0 : index
    %c0_39 = arith.constant 0 : index
    %55 = vector.load %arg1[%c0_36, %c2_37, %c0_38, %c0_39] : memref<1x18x10x1xf32, #tpu.memory_space<vmem>>, vector<1x16x8x1xf32>
    %56 = vector.shape_cast %55 : vector<1x16x8x1xf32> to vector<16x8x1xf32>
    %57 = vector.shape_cast %56 : vector<16x8x1xf32> to vector<128x1xf32>
    %c6 = arith.constant 6 : index
    %c0_40 = arith.constant 0 : index
    %c0_41 = arith.constant 0 : index
    %58 = vector.load %arg2[%c6, %c0_40, %c0_41] : memref<9x1x64xf32, #tpu.memory_space<vmem>>, vector<1x1x64xf32>
    %59 = vector.shape_cast %58 : vector<1x1x64xf32> to vector<1x64xf32>
    %60 = vector.broadcast %57 : vector<128x1xf32> to vector<128x64xf32>
    %61 = vector.broadcast %59 : vector<1x64xf32> to vector<128x64xf32>
    %62 = arith.mulf %60, %61 : vector<128x64xf32>
    %63 = arith.addf %54, %62 : vector<128x64xf32>
    %c0_42 = arith.constant 0 : index
    %c2_43 = arith.constant 2 : index
    %c1_44 = arith.constant 1 : index
    %c0_45 = arith.constant 0 : index
    %64 = vector.load %arg1[%c0_42, %c2_43, %c1_44, %c0_45] : memref<1x18x10x1xf32, #tpu.memory_space<vmem>>, vector<1x16x8x1xf32>
    %65 = vector.shape_cast %64 : vector<1x16x8x1xf32> to vector<16x8x1xf32>
    %66 = vector.shape_cast %65 : vector<16x8x1xf32> to vector<128x1xf32>
    %c7 = arith.constant 7 : index
    %c0_46 = arith.constant 0 : index
    %c0_47 = arith.constant 0 : index
    %67 = vector.load %arg2[%c7, %c0_46, %c0_47] : memref<9x1x64xf32, #tpu.memory_space<vmem>>, vector<1x1x64xf32>
    %68 = vector.shape_cast %67 : vector<1x1x64xf32> to vector<1x64xf32>
    %69 = vector.broadcast %66 : vector<128x1xf32> to vector<128x64xf32>
    %70 = vector.broadcast %68 : vector<1x64xf32> to vector<128x64xf32>
    %71 = arith.mulf %69, %70 : vector<128x64xf32>
    %72 = arith.addf %63, %71 : vector<128x64xf32>
    %c0_48 = arith.constant 0 : index
    %c2_49 = arith.constant 2 : index
    %c2_50 = arith.constant 2 : index
    %c0_51 = arith.constant 0 : index
    %73 = vector.load %arg1[%c0_48, %c2_49, %c2_50, %c0_51] : memref<1x18x10x1xf32, #tpu.memory_space<vmem>>, vector<1x16x8x1xf32>
    %74 = vector.shape_cast %73 : vector<1x16x8x1xf32> to vector<16x8x1xf32>
    %75 = vector.shape_cast %74 : vector<16x8x1xf32> to vector<128x1xf32>
    %c8 = arith.constant 8 : index
    %c0_52 = arith.constant 0 : index
    %c0_53 = arith.constant 0 : index
    %76 = vector.load %arg2[%c8, %c0_52, %c0_53] : memref<9x1x64xf32, #tpu.memory_space<vmem>>, vector<1x1x64xf32>
    %77 = vector.shape_cast %76 : vector<1x1x64xf32> to vector<1x64xf32>
    %78 = vector.broadcast %75 : vector<128x1xf32> to vector<128x64xf32>
    %79 = vector.broadcast %77 : vector<1x64xf32> to vector<128x64xf32>
    %80 = arith.mulf %78, %79 : vector<128x64xf32>
    %81 = arith.addf %72, %80 : vector<128x64xf32>
    %c0_54 = arith.constant 0 : index
    %c0_55 = arith.constant 0 : index
    %82 = vector.load %arg3[%c0_54, %c0_55] : memref<1x64xf32, #tpu.memory_space<vmem>>, vector<1x64xf32>
    %83 = vector.broadcast %82 : vector<1x64xf32> to vector<128x64xf32>
    %84 = arith.addf %81, %83 : vector<128x64xf32>
    %85 = vector.shape_cast %84 : vector<128x64xf32> to vector<1x16x8x64xf32>
    %c0_56 = arith.constant 0 : index
    %c0_57 = arith.constant 0 : index
    %c0_58 = arith.constant 0 : index
    %c0_59 = arith.constant 0 : index
    %86 = vector.load %arg4[%c0_56, %c0_57, %c0_58, %c0_59] : memref<1x16x8x64xf32, #tpu.memory_space<vmem>>, vector<1x16x8x64xf32>
    tpu.vector_store %arg4[%c0_56, %c0_57, %c0_58, %c0_59], %85 {strides = array<i32>} : memref<1x16x8x64xf32, #tpu.memory_space<vmem>>, vector<1x16x8x64xf32>,
    %c0_i32 = arith.constant 0 : i32
    %87 = arith.cmpi eq, %arg0, %c0_i32 : i32
    %88 = arith.extui %87 : i1 to i32
    %c0_i32_60 = arith.constant 0 : i32
    %89 = arith.cmpi ne, %88, %c0_i32_60 : i32
    scf.if %89 {
      %cst_71 = arith.constant 0.000000e+00 : f32
      %101 = vector.broadcast %cst_71 : f32 to vector<1x64xf32>
      %c0_72 = arith.constant 0 : index
      %c0_73 = arith.constant 0 : index
      %102 = vector.load %arg5[%c0_72, %c0_73] : memref<1x64xf32, #tpu.memory_space<vmem>>, vector<1x64xf32>
      tpu.vector_store %arg5[%c0_72, %c0_73], %101 {strides = array<i32>} : memref<1x64xf32, #tpu.memory_space<vmem>>, vector<1x64xf32>,
      %cst_74 = arith.constant 0.000000e+00 : f32
      %103 = vector.broadcast %cst_74 : f32 to vector<1x64xf32>
      %c0_75 = arith.constant 0 : index
      %c0_76 = arith.constant 0 : index
      %104 = vector.load %arg6[%c0_75, %c0_76] : memref<1x64xf32, #tpu.memory_space<vmem>>, vector<1x64xf32>
      tpu.vector_store %arg6[%c0_75, %c0_76], %103 {strides = array<i32>} : memref<1x64xf32, #tpu.memory_space<vmem>>, vector<1x64xf32>,
    } else {
    }
    %c0_61 = arith.constant 0 : index
    %c0_62 = arith.constant 0 : index
    %90 = vector.load %arg5[%c0_61, %c0_62] : memref<1x64xf32, #tpu.memory_space<vmem>>, vector<1x64xf32>
    %cst_63 = arith.constant dense<0.000000e+00> : vector<64xf32>
    %91 = vector.multi_reduction <add>, %84, %cst_63 [0] : vector<128x64xf32> to vector<64xf32>
    %92 = vector.shape_cast %91 : vector<64xf32> to vector<1x64xf32>
    %93 = arith.addf %90, %92 : vector<1x64xf32>
    %c0_64 = arith.constant 0 : index
    %c0_65 = arith.constant 0 : index
    %94 = vector.load %arg5[%c0_64, %c0_65] : memref<1x64xf32, #tpu.memory_space<vmem>>, vector<1x64xf32>
    tpu.vector_store %arg5[%c0_64, %c0_65], %93 {strides = array<i32>} : memref<1x64xf32, #tpu.memory_space<vmem>>, vector<1x64xf32>,
    %c0_66 = arith.constant 0 : index
    %c0_67 = arith.constant 0 : index
    %95 = vector.load %arg6[%c0_66, %c0_67] : memref<1x64xf32, #tpu.memory_space<vmem>>, vector<1x64xf32>
    %96 = arith.mulf %84, %84 : vector<128x64xf32>
    %cst_68 = arith.constant dense<0.000000e+00> : vector<64xf32>
    %97 = vector.multi_reduction <add>, %96, %cst_68 [0] : vector<128x64xf32> to vector<64xf32>
    %98 = vector.shape_cast %97 : vector<64xf32> to vector<1x64xf32>
    %99 = arith.addf %95, %98 : vector<1x64xf32>
    %c0_69 = arith.constant 0 : index
    %c0_70 = arith.constant 0 : index
    %100 = vector.load %arg6[%c0_69, %c0_70] : memref<1x64xf32, #tpu.memory_space<vmem>>, vector<1x64xf32>
    tpu.vector_store %arg6[%c0_69, %c0_70], %99 {strides = array<i32>} : memref<1x64xf32, #tpu.memory_space<vmem>>, vector<1x64xf32>,
    return
  }
  func.func @transform_0(%arg0: i32) -> (i32, i32, i32, i32) {
    %c0_i32 = arith.constant 0 : i32
    %c0_i32_0 = arith.constant 0 : i32
    %c0_i32_1 = arith.constant 0 : i32
    %c0_i32_2 = arith.constant 0 : i32
    return %arg0, %c0_i32, %c0_i32_0, %c0_i32_1 : i32, i32, i32, i32
  }
  func.func @transform_1(%arg0: i32) -> (i32, i32, i32) {
    %c0_i32 = arith.constant 0 : i32
    %c0_i32_0 = arith.constant 0 : i32
    %c0_i32_1 = arith.constant 0 : i32
    %c0_i32_2 = arith.constant 0 : i32
    return %c0_i32, %c0_i32_0, %c0_i32_1 : i32, i32, i32
  }
  func.func @transform_2(%arg0: i32) -> (i32, i32) {
    %c0_i32 = arith.constant 0 : i32
    %c0_i32_0 = arith.constant 0 : i32
    %c0_i32_1 = arith.constant 0 : i32
    return %c0_i32, %c0_i32_0 : i32, i32
  }
  func.func @transform_3(%arg0: i32) -> (i32, i32, i32, i32) {
    %c0_i32 = arith.constant 0 : i32
    %c0_i32_0 = arith.constant 0 : i32
    %c0_i32_1 = arith.constant 0 : i32
    %c0_i32_2 = arith.constant 0 : i32
    return %arg0, %c0_i32, %c0_i32_0, %c0_i32_1 : i32, i32, i32, i32
  }
  func.func @transform_4(%arg0: i32) -> (i32, i32) {
    %c0_i32 = arith.constant 0 : i32
    %c0_i32_0 = arith.constant 0 : i32
    %c0_i32_1 = arith.constant 0 : i32
    return %c0_i32, %c0_i32_0 : i32, i32
  }
  func.func @transform_5(%arg0: i32) -> (i32, i32) {
    %c0_i32 = arith.constant 0 : i32
    %c0_i32_0 = arith.constant 0 : i32
    %c0_i32_1 = arith.constant 0 : i32
    return %c0_i32, %c0_i32_0 : i32, i32
  }
}

</mosaic_0001>

<bundles_post_ra>
// kernel: tpu_custom_call.1
= control target key start
LH: loop header
LB: loop body
LE: loop exit
PB: predicated region body
PF: predicated region fallthrough
CT: control target
= control target key end

     0   :  { %11 = vsyncpa [#allocation3], 0  ;;  %s3191_s0 = inlined_call_operand.vmem [shape: f32[2,18,10,1], index: 0, kind: input, shape index: {}]   ;;  %s3192_s1 = inlined_call_operand.vmem [shape: f32[9,1,64], index: 1, kind: input, shape index: {}]   ;;  %s3193_s2 = inlined_call_operand.vmem [shape: f32[1,64], index: 2, kind: input, shape index: {}]   ;;  %s3194_s3 = inlined_call_operand.hbm [shape: f32[2,16,8,64], index: 3, kind: output, shape index: {0}]   ;;  %s3195_s4 = inlined_call_operand.hbm [shape: f32[1,64], index: 4, kind: output, shape index: {1}]   ;;  %s3196_s5 = inlined_call_operand.hbm [shape: f32[1,64], index: 5, kind: output, shape index: {2}]  }
   0x1   :  { %13 = vsyncpa [#allocation3 + $0x1], 0 }
   0x2   :  { %14 = vsyncpa [#allocation5], 0  ;;  %s2055_s18 = smov 0   ;;  %s2057_s19 = smov 0  }
   0x3   :  { %s2059_s20 = smov 0   ;;  %s2061_s21 = smov 0  }
   0x4 LB: > { %s2076_s22 = sadd.s32 4294967295, %s2016_s21   ;;  %s1707_s23 = sadd.s32 4294967294, %s2016_s21   ;;  %s2016_s21 = sphi %s2061_s21, %s3285_s21   ;;  %s2012_s20 = sphi %s2059_s20, %s3284_s20   ;;  %s2008_s19 = sphi %s2057_s19, %s3283_s19   ;;  %s2004_s18 = sphi %s2055_s18, %s3282_s18  }
   0x5   : > { %s2080_s24 = sadd.s32 1, %s2016_s21   ;;  %s95_s25 = sadd.s32 1, %s2012_s20 }
   0x6   : > { %s92_s26 = ssub.s32 %s2016_s21, %s2080_s24  ;;  %p105_p0 = scmp.ne.s32.totalorder %s2012_s20, %s2008_s19 }
   0x7   : > { %p93_p1 = scmp.eq.s32.totalorder %s92_s26, 0  ;;  %p106_p2 = scmp.eq.s32.totalorder %s2076_s22, 1 }
   0x8   : > { %p111_p3 = scmp.ne.s32.totalorder %s2008_s19, %s2004_s18  ;;  %p112_p4 = scmp.eq.s32.totalorder %s1707_s23, 1 }
   0x9   : > { %s2091_s27 = scalar_select %p93_p1, %s2012_s20, %s95_s25  }
   0xa   : > { %p2095_p5 = por %p106_p2, %p105_p0  ;;  %p2099_p6 = por %p112_p4, %p111_p3 }
   0xb   : > { %p1710_p7 = scmp.ge.s32.totalorder %s2016_s21, 1  ;;  %p186_p8 = scmp.lt.s32.totalorder %s2016_s21, 3 }
   0xd   : > { %p187_p9 = pnand %p1710_p7, %p186_p8 }
   0xf   : > { %190 = sbr.rel (%p187_p9) target bundleno = 549 (0x225), region = 32 }
  0x16   : > { %p214_p10 = scmp.lt.s32.totalorder %s2076_s22, 1  ;;  %v2018_v0 = vmov 0   ;;  %s207_s12 = sand.u32 1, %s2008_s19   ;;  %vm1467_vm0 = vcmask 523264  }
  0x17   : > { %1897 = vset.pattern.permute.xlu1 %v2018_v0  ;;  %1896 = vset.pattern.permute.xlu0 %v2018_v0  ;;  %s1711_s13 = sshll.u32 %s207_s12, 7  ;;  %p1827_p11 = scmp.ne.s32.totalorder %s2076_s22, 0 }
  0x18   : > { %s215_s30 = scalar_select %p214_p10, %s2076_s22, 1 }
  0x19   : > { %s2868_s16 = scalar_lea.vmem [#allocation2], %s1711_s13  ;;  %vm1488_vm1 = vcmask (!%p1827_p11), 516096  }
  0x1a   : > { %s1838_s6 = smul.u32 288, %s215_s30 }
  0x1c   : > { %s2110_s9 = scalar_lea.vmem %s3191_s0, %s1838_s6 }
  0x1d   : > { %v2113_v1 = vld [vmem:[%s2110_s9 + $0x20] sm:$0xff]  ;;  %v2118_v3 = vld [vmem:[%s2110_s9 + $0x30] sm:$0xff] }
  0x1e   : > { %v219_v2 = vld [vmem:[%s2110_s9] sm:$0xff]  ;;  %248 = vperm.xlu1 %1897, %v2113_v1   ;;  %v2121_v4 = vld [vmem:[%s2110_s9 + $0x10] sm:$0xff] }
  0x1f   : > { %238 = vperm.xlu0 %1896, %v219_v2   ;;  %v2126_v5 = vld [vmem:[%s2110_s9 + $0x50] sm:$0xff]  ;;  %v2129_v6 = vld [vmem:[%s2110_s9 + $0x40] sm:$0xff] }
  0x20   : > { %v2134_v7 = vld [vmem:[%s2110_s9 + $0x70] sm:$0xff]  ;;  %v2137_v8 = vld [vmem:[%s2110_s9 + $0x60] sm:$0xff] }
  0x21   : > { %v2142_v9 = vld [vmem:[%s2110_s9 + $0x90] sm:$0xff]  ;;  %v2145_v10 = vld [vmem:[%s2110_s9 + $0x80] sm:$0xff] }
  0x22   : > { %253 = vperm.xlu1 %1897, %v2118_v3   ;;  %v2150_v11 = vld [vmem:[%s2110_s9 + $0xb0] sm:$0xff]  ;;  %v2153_v12 = vld [vmem:[%s2110_s9 + $0xa0] sm:$0xff] }
  0x23   : > { %243 = vperm.xlu0 %1896, %v2121_v4   ;;  %v2158_v13 = vld [vmem:[%s2110_s9 + $0xd0] sm:$0xff]  ;;  %v2161_v14 = vld [vmem:[%s2110_s9 + $0xc0] sm:$0xff] }
  0x24   : > { %v2166_v15 = vld [vmem:[%s2110_s9 + $0xf0] sm:$0xff]  ;;  %v2169_v16 = vld [vmem:[%s2110_s9 + $0xe0] sm:$0xff] }
  0x25   : > { %v2174_v17 = vld [vmem:[%s2110_s9 + $0x11] sm:$0xff]  ;;  %v354_v18 = vld [vmem:[%s2110_s9 + $0x1] sm:$0xff] }
  0x26   : > { %263 = vperm.xlu1 %1897, %v2126_v5   ;;  %v2179_v19 = vld [vmem:[%s2110_s9 + $0x31] sm:$0xff]  ;;  %v2182_v20 = vld [vmem:[%s2110_s9 + $0x21] sm:$0xff] }
  0x27   : > { %258 = vperm.xlu0 %1896, %v2129_v6   ;;  %v2187_v21 = vld [vmem:[%s2110_s9 + $0x51] sm:$0xff]  ;;  %v2190_v22 = vld [vmem:[%s2110_s9 + $0x41] sm:$0xff] }
  0x28   : > { %v2195_v23 = vld [vmem:[%s2110_s9 + $0x71] sm:$0xff]  ;;  %v2198_v24 = vld [vmem:[%s2110_s9 + $0x61] sm:$0xff] }
  0x29   : > { %v2203_v25 = vld [vmem:[%s2110_s9 + $0x91] sm:$0xff]  ;;  %v2206_v26 = vld [vmem:[%s2110_s9 + $0x81] sm:$0xff] }
  0x2a   : > { %273 = vperm.xlu1 %1897, %v2134_v7   ;;  %v2211_v27 = vld [vmem:[%s2110_s9 + $0xb1] sm:$0xff]  ;;  %v2214_v28 = vld [vmem:[%s2110_s9 + $0xa1] sm:$0xff] }
  0x2b   : > { %268 = vperm.xlu0 %1896, %v2137_v8   ;;  %v2219_v29 = vld [vmem:[%s2110_s9 + $0xd1] sm:$0xff]  ;;  %v2222_v30 = vld [vmem:[%s2110_s9 + $0xc1] sm:$0xff] }
  0x2c   : > { %v2227_v31 = vld [vmem:[%s2110_s9 + $0xf1] sm:$0xff]  ;;  %v2230_v32 = vld [vmem:[%s2110_s9 + $0xe1] sm:$0xff] }
  0x2d   : > { %3218 = vst [vmem:[#allocation9_spill] sm:$0xff] %v2227_v31  ;;  %3219 = vst [vmem:[#allocation10_spill] sm:$0xff] %v2230_v32  ;;  %v2235_v33 = vld [vmem:[%s2110_s9 + $0x12] sm:$0xff]  ;;  %v490_v34 = vld [vmem:[%s2110_s9 + $0x2] sm:$0xff] }
  0x2e   : > { %283 = vperm.xlu1 %1897, %v2142_v9   ;;  %v2240_v35 = vld [vmem:[%s2110_s9 + $0x32] sm:$0xff]  ;;  %v2243_v36 = vld [vmem:[%s2110_s9 + $0x22] sm:$0xff] }
  0x2f   : > { %278 = vperm.xlu0 %1896, %v2145_v10   ;;  %3220 = vst [vmem:[#allocation11_spill] sm:$0xff] %v2240_v35  ;;  %3221 = vst [vmem:[#allocation12_spill] sm:$0xff] %v2243_v36  ;;  %v2248_v37 = vld [vmem:[%s2110_s9 + $0x52] sm:$0xff]  ;;  %v2251_v38 = vld [vmem:[%s2110_s9 + $0x42] sm:$0xff] }
  0x30   : > { %3222 = vst [vmem:[#allocation13_spill] sm:$0xff] %v2248_v37  ;;  %3223 = vst [vmem:[#allocation14_spill] sm:$0xff] %v2251_v38  ;;  %v2256_v39 = vld [vmem:[%s2110_s9 + $0x72] sm:$0xff]  ;;  %v2259_v40 = vld [vmem:[%s2110_s9 + $0x62] sm:$0xff] }
  0x31   : > { %3224 = vst [vmem:[#allocation15_spill] sm:$0xff] %v2256_v39  ;;  %3225 = vst [vmem:[#allocation16_spill] sm:$0xff] %v2259_v40  ;;  %v2264_v41 = vld [vmem:[%s2110_s9 + $0x92] sm:$0xff]  ;;  %v2267_v42 = vld [vmem:[%s2110_s9 + $0x82] sm:$0xff] }
  0x32   : > { %293 = vperm.xlu1 %1897, %v2150_v11   ;;  %3226 = vst [vmem:[#allocation17_spill] sm:$0xff] %v2264_v41  ;;  %3227 = vst [vmem:[#allocation18_spill] sm:$0xff] %v2267_v42  ;;  %v2272_v43 = vld [vmem:[%s2110_s9 + $0xb2] sm:$0xff]  ;;  %v2275_v44 = vld [vmem:[%s2110_s9 + $0xa2] sm:$0xff] }
  0x33   : > { %288 = vperm.xlu0 %1896, %v2153_v12   ;;  %3228 = vst [vmem:[#allocation19_spill] sm:$0xff] %v2272_v43  ;;  %3229 = vst [vmem:[#allocation20_spill] sm:$0xff] %v2275_v44  ;;  %v2280_v45 = vld [vmem:[%s2110_s9 + $0xd2] sm:$0xff]  ;;  %v2283_v46 = vld [vmem:[%s2110_s9 + $0xc2] sm:$0xff] }
  0x34   : > { %3230 = vst [vmem:[#allocation21_spill] sm:$0xff] %v2280_v45  ;;  %3231 = vst [vmem:[#allocation22_spill] sm:$0xff] %v2283_v46  ;;  %v2288_v47 = vld [vmem:[%s2110_s9 + $0xf2] sm:$0xff]  ;;  %v2291_v48 = vld [vmem:[%s2110_s9 + $0xe2] sm:$0xff] }
  0x35   : > { %3232 = vst [vmem:[#allocation23_spill] sm:$0xff] %v2288_v47  ;;  %3233 = vst [vmem:[#allocation24_spill] sm:$0xff] %v2291_v48  ;;  %v2310_v49 = vld [vmem:[%s2110_s9 + $0x100] sm:$0xff] }
  0x36   : > { %303 = vperm.xlu1 %1897, %v2158_v13   ;;  %v2357_v0 = vld [vmem:[%s2110_s9 + $0x101] sm:$0xff] }
  0x37   : > { %298 = vperm.xlu0 %1896, %v2161_v14   ;;  %3235 = vst [vmem:[#allocation26_spill] sm:$0xff] %v2357_v0 }
  0x3a   : > { %313 = vperm.xlu1 %1897, %v2166_v15  }
  0x3b   : > { %308 = vperm.xlu0 %1896, %v2169_v16  }
  0x3e   : > { %379 = vperm.xlu1 %1897, %v2174_v17  }
  0x3f   : > { %374 = vperm.xlu0 %1896, %v354_v18  }
  0x42   : > { %389 = vperm.xlu1 %1897, %v2179_v19  }
  0x43   : > { %384 = vperm.xlu0 %1896, %v2182_v20  }
  0x46   : > { %399 = vperm.xlu1 %1897, %v2187_v21  }
  0x47   : > { %394 = vperm.xlu0 %1896, %v2190_v22  }
  0x4a   : > { %409 = vperm.xlu1 %1897, %v2195_v23  }
  0x4b   : > { %404 = vperm.xlu0 %1896, %v2198_v24  }
  0x4e   : > { %419 = vperm.xlu1 %1897, %v2203_v25  }
  0x4f   : > { %414 = vperm.xlu0 %1896, %v2206_v26  }
  0x52   : > { %429 = vperm.xlu1 %1897, %v2211_v27  }
  0x53   : > { %424 = vperm.xlu0 %1896, %v2214_v28  }
  0x56   : > { %439 = vperm.xlu1 %1897, %v2219_v29  }
  0x57   : > { %434 = vperm.xlu0 %1896, %v2222_v30  }
  0x5a   : > { %449 = vperm.xlu1 %1897, %v2227_v31  }
  0x5b   : > { %444 = vperm.xlu0 %1896, %v2230_v32  }
  0x5e   : > { %515 = vperm.xlu1 %1897, %v2235_v33  }
  0x5f   : > { %510 = vperm.xlu0 %1896, %v490_v34  }
  0x62   : > { %525 = vperm.xlu1 %1897, %v2240_v35  }
  0x63   : > { %520 = vperm.xlu0 %1896, %v2243_v36  }
  0x66   : > { %535 = vperm.xlu1 %1897, %v2248_v37  }
  0x67   : > { %530 = vperm.xlu0 %1896, %v2251_v38  }
  0x6a   : > { %545 = vperm.xlu1 %1897, %v2256_v39  }
  0x6b   : > { %540 = vperm.xlu0 %1896, %v2259_v40  }
  0x6e   : > { %555 = vperm.xlu1 %1897, %v2264_v41  }
  0x6f   : > { %550 = vperm.xlu0 %1896, %v2267_v42  }
  0x72   : > { %565 = vperm.xlu1 %1897, %v2272_v43  }
  0x73   : > { %560 = vperm.xlu0 %1896, %v2275_v44  }
  0x76   : > { %575 = vperm.xlu1 %1897, %v2280_v45  }
  0x77   : > { %570 = vperm.xlu0 %1896, %v2283_v46  }
  0x7a   : > { %585 = vperm.xlu1 %1897, %v2288_v47  }
  0x7b   : > { %580 = vperm.xlu0 %1896, %v2291_v48  }
  0x7e   : > { %652 = vperm.xlu1 %1897, %v2113_v1  }
  0x7f   : > { %647 = vperm.xlu0 %1896, %v2121_v4  }
  0x82   : > { %662 = vperm.xlu1 %1897, %v2129_v6  }
  0x83   : > { %657 = vperm.xlu0 %1896, %v2118_v3  }
  0x86   : > { %672 = vperm.xlu1 %1897, %v2137_v8  }
  0x87   : > { %667 = vperm.xlu0 %1896, %v2126_v5  }
  0x8a   : > { %682 = vperm.xlu1 %1897, %v2145_v10  }
  0x8b   : > { %677 = vperm.xlu0 %1896, %v2134_v7  }
  0x8e   : > { %692 = vperm.xlu1 %1897, %v2153_v12  }
  0x8f   : > { %687 = vperm.xlu0 %1896, %v2142_v9  }
  0x92   : > { %702 = vperm.xlu1 %1897, %v2161_v14  }
  0x93   : > { %697 = vperm.xlu0 %1896, %v2150_v11  }
  0x96   : > { %712 = vperm.xlu1 %1897, %v2169_v16  }
  0x97   : > { %707 = vperm.xlu0 %1896, %v2158_v13  }
  0x9a   : > { %722 = vperm.xlu1 %1897, %v2310_v49  }
  0x9b   : > { %717 = vperm.xlu0 %1896, %v2166_v15  }
  0x9d   : > { %v2314_v50 = vpop.permute.xlu1 %248 }
  0x9e   : > { %v2316_v51 = vpop.permute.xlu0 %238  ;;  %788 = vperm.xlu1 %1897, %v2182_v20  }
  0x9f   : > { %783 = vperm.xlu0 %1896, %v2174_v17  }
  0xa1   : > { %v2320_v52 = vpop.permute.xlu1 %253 }
  0xa2   : > { %v2322_v53 = vpop.permute.xlu0 %243  ;;  %798 = vperm.xlu1 %1897, %v2190_v22  }
  0xa3   : > { %793 = vperm.xlu0 %1896, %v2179_v19  }
  0xa5   : > { %v2326_v54 = vpop.permute.xlu1 %263 }
  0xa6   : > { %v2328_v55 = vpop.permute.xlu0 %258  ;;  %808 = vperm.xlu1 %1897, %v2198_v24  }
  0xa7   : > { %803 = vperm.xlu0 %1896, %v2187_v21  }
  0xa9   : > { %v2332_v56 = vpop.permute.xlu1 %273 }
  0xaa   : > { %v2334_v57 = vpop.permute.xlu0 %268  ;;  %818 = vperm.xlu1 %1897, %v2206_v26  }
  0xab   : > { %813 = vperm.xlu0 %1896, %v2195_v23  }
  0xad   : > { %v2338_v58 = vpop.permute.xlu1 %283 }
  0xae   : > { %v2340_v59 = vpop.permute.xlu0 %278  ;;  %828 = vperm.xlu1 %1897, %v2214_v28  }
  0xaf   : > { %823 = vperm.xlu0 %1896, %v2203_v25  }
  0xb1   : > { %v2344_v60 = vpop.permute.xlu1 %293 }
  0xb2   : > { %v2346_v61 = vpop.permute.xlu0 %288  ;;  %838 = vperm.xlu1 %1897, %v2222_v30  }
  0xb3   : > { %833 = vperm.xlu0 %1896, %v2211_v27  }
  0xb5   : > { %v2350_v62 = vpop.permute.xlu1 %303 }
  0xb6   : > { %v2352_v63 = vpop.permute.xlu0 %298  ;;  %848 = vperm.xlu1 %1897, %v2230_v32  }
  0xb7   : > { %3234 = vst [vmem:[#allocation25_spill] sm:$0xff] %v2352_v63  ;;  %843 = vperm.xlu0 %1896, %v2219_v29  }
  0xb9   : > { %v2359_v2 = vpop.permute.xlu1 %313 }
  0xba   : > { %v2361_v4 = vpop.permute.xlu0 %308  ;;  %858 = vperm.xlu1 %1897, %v2357_v0  }
  0xbb   : > { %853 = vperm.xlu0 %1896, %v2227_v31  }
  0xbd   : > { %v2365_v17 = vpop.permute.xlu1 %379 }
  0xbe   : > { %v2367_v18 = vpop.permute.xlu0 %374  ;;  %924 = vperm.xlu1 %1897, %v2243_v36  }
  0xbf   : > { %919 = vperm.xlu0 %1896, %v2235_v33  }
  0xc1   : > { %v2371_v34 = vpop.permute.xlu1 %389 }
  0xc2   : > { %v2373_v63 = vpop.permute.xlu0 %384  ;;  %934 = vperm.xlu1 %1897, %v2251_v38  }
  0xc3   : > { %929 = vperm.xlu0 %1896, %v2240_v35  }
  0xc5   : > { %v2377_v32 = vpop.permute.xlu1 %399 }
  0xc6   : > { %v2379_v0 = vpop.permute.xlu0 %394  ;;  %944 = vperm.xlu1 %1897, %v2259_v40  }
  0xc7   : > { %939 = vperm.xlu0 %1896, %v2248_v37  }
  0xc9   : > { %v2383_v31 = vpop.permute.xlu1 %409 }
  0xca   : > { %v2385_v33 = vpop.permute.xlu0 %404  ;;  %954 = vperm.xlu1 %1897, %v2267_v42  }
  0xcb   : > { %949 = vperm.xlu0 %1896, %v2256_v39   ;;  %v2408_v39 = vld [vmem:[%s2110_s9 + $0x102] sm:$0xff] }
  0xcc   : > { %3238 = vst [vmem:[#allocation29_spill] sm:$0xff] %v2408_v39 }
  0xcd   : > { %v2389_v38 = vpop.permute.xlu1 %419 }
  0xce   : > { %v2391_v36 = vpop.permute.xlu0 %414  ;;  %964 = vperm.xlu1 %1897, %v2275_v44  }
  0xcf   : > { %959 = vperm.xlu0 %1896, %v2264_v41  }
  0xd1   : > { %v2395_v40 = vpop.permute.xlu1 %429 }
  0xd2   : > { %v2397_v37 = vpop.permute.xlu0 %424  ;;  %974 = vperm.xlu1 %1897, %v2283_v46  }
  0xd3   : > { %969 = vperm.xlu0 %1896, %v2272_v43  }
  0xd5   : > { %v2401_v35 = vpop.permute.xlu1 %439 }
  0xd6   : > { %3236 = vst [vmem:[#allocation27_spill] sm:$0xff] %v2401_v35  ;;  %v2403_v42 = vpop.permute.xlu0 %434  ;;  %984 = vperm.xlu1 %1897, %v2291_v48  }
  0xd7   : > { %3237 = vst [vmem:[#allocation28_spill] sm:$0xff] %v2403_v42  ;;  %979 = vperm.xlu0 %1896, %v2280_v45  }
  0xd9   : > { %v2410_v44 = vpop.permute.xlu1 %449 }
  0xda   : > { %v2412_v41 = vpop.permute.xlu0 %444  ;;  %994 = vperm.xlu1 %1897, %v2408_v39  }
  0xdb   : > { %989 = vperm.xlu0 %1896, %v2288_v47  }
  0xdd   : > { %v2416_v46 = vpop.permute.xlu1 %515 }
  0xde   : > { %v2418_v43 = vpop.permute.xlu0 %510  ;;  %1061 = vperm.xlu1 %1897, %v2118_v3  }
  0xdf   : > { %1056 = vperm.xlu0 %1896, %v2113_v1  }
  0xe1   : > { %v2422_v48 = vpop.permute.xlu1 %525 }
  0xe2   : > { %v2424_v45 = vpop.permute.xlu0 %520  ;;  %1071 = vperm.xlu1 %1897, %v2126_v5  }
  0xe3   : > { %1066 = vperm.xlu0 %1896, %v2129_v6  }
  0xe5   : > { %v2428_v42 = vpop.permute.xlu1 %535 }
  0xe6   : > { %v2430_v39 = vpop.permute.xlu0 %530  ;;  %1081 = vperm.xlu1 %1897, %v2134_v7  }
  0xe7   : > { %1076 = vperm.xlu0 %1896, %v2137_v8  }
  0xe9   : > { %v2434_v47 = vpop.permute.xlu1 %545 }
  0xea   : > { %v2436_v1 = vpop.permute.xlu0 %540  ;;  %1091 = vperm.xlu1 %1897, %v2142_v9  }
  0xeb   : > { %1086 = vperm.xlu0 %1896, %v2145_v10   ;;  %v1787_v10 = vld [vmem:[%s2110_s9 + $0x110] sm:$0xff] }
  0xed   : > { %v2440_v3 = vpop.permute.xlu1 %555 }
  0xee   : > { %v2442_v5 = vpop.permute.xlu0 %550  ;;  %1101 = vperm.xlu1 %1897, %v2150_v11  }
  0xef   : > { %1096 = vperm.xlu0 %1896, %v2153_v12  }
  0xf1   : > { %v2446_v6 = vpop.permute.xlu1 %565 }
  0xf2   : > { %3239 = vst [vmem:[#allocation30_spill] sm:$0xff] %v2446_v6  ;;  %v2448_v7 = vpop.permute.xlu0 %560  ;;  %1111 = vperm.xlu1 %1897, %v2158_v13   ;;  %v1805_v6 = vld [vmem:[%s2110_s9 + $0x111] sm:$0xff] }
  0xf3   : > { %3240 = vst [vmem:[#allocation31_spill] sm:$0xff] %v2448_v7  ;;  %1106 = vperm.xlu0 %1896, %v2161_v14  }
  0xf5   : > { %v2452_v8 = vpop.permute.xlu1 %575 }
  0xf6   : > { %3241 = vst [vmem:[#allocation32_spill] sm:$0xff] %v2452_v8  ;;  %v2454_v9 = vpop.permute.xlu0 %570  ;;  %1121 = vperm.xlu1 %1897, %v2166_v15  }
  0xf7   : > { %3242 = vst [vmem:[#allocation33_spill] sm:$0xff] %v2454_v9  ;;  %1116 = vperm.xlu0 %1896, %v2169_v16  }
  0xf9   : > { %v586_v11 = vpop.permute.xlu1 %585 }
  0xfa   : > { %v581_v35 = vpop.permute.xlu0 %580  ;;  %1131 = vperm.xlu1 %1897, %v1787_v10  }
  0xfb   : > { %1126 = vperm.xlu0 %1896, %v2310_v49  }
  0xfd   : > { %v2460_v12 = vpop.permute.xlu1 %652 }
  0xfe   : > { %v2462_v7 = vpop.permute.xlu0 %647  ;;  %1197 = vperm.xlu1 %1897, %v2179_v19  }
  0xff   : > { %1192 = vperm.xlu0 %1896, %v2182_v20   ;;  %v2487_v20 = vld [vmem:[%s3192_s1] ss:$0 sm:$0xff] }
 0x100   : > { %3243 = vst [vmem:[#allocation34_spill] sm:$0xff] %v2487_v20  ;;  %v323_v10 = vmul.f32 %v2487_v20, %v2322_v53  ;;  %v2514_v9 = vmul.f32 %v2487_v20, %v2332_v56 }
 0x101   : > { %v2466_v13 = vpop.permute.xlu1 %662 }
 0x102   : > { %v2468_v14 = vpop.permute.xlu0 %657  ;;  %1207 = vperm.xlu1 %1897, %v2187_v21  }
 0x103   : > { %1202 = vperm.xlu0 %1896, %v2190_v22  }
 0x105   : > { %v2472_v15 = vpop.permute.xlu1 %672 }
 0x106   : > { %v2474_v16 = vpop.permute.xlu0 %667  ;;  %1217 = vperm.xlu1 %1897, %v2195_v23   ;;  %v2498_v23 = vld [vmem:[%s3192_s1 + $0x1] ss:$0 sm:$0xff] }
 0x107   : > { %1212 = vperm.xlu0 %1896, %v2198_v24   ;;  %v324_v24 = vmul.f32 %v2487_v20, %v2314_v50  ;;  %v459_v53 = vmul.f32 %v2498_v23, %v2365_v17  ;;  %v473_v56 = vmul.f32 %v2498_v23, %v2410_v44  ;;  %v2555_v44 = vld [vmem:[%s3192_s1 + $0x2] ss:$0 sm:$0xff] }
 0x108   : > { %v608_v17 = vmul.f32 %v2555_v44, %v581_v35  ;;  %v3251_v35 = vld [vmem:[#allocation10_spill] sm:$0xff] }
 0x109   : > { %v2478_v49 = vpop.permute.xlu1 %682 }
 0x10a   : > { %v2480_v19 = vpop.permute.xlu0 %677  ;;  %1227 = vperm.xlu1 %1897, %v2203_v25   ;;  %v322_v25 = vmul.f32 %v2487_v20, %v2316_v51  ;;  %v2522_v51 = vmul.f32 %v2487_v20, %v2334_v57  ;;  %v472_v57 = vmul.f32 %v2498_v23, %v2412_v41  ;;  %v336_v41 = vmul.f32 %v2487_v20, %v2361_v4 }
 0x10b   : > { %1222 = vperm.xlu0 %1896, %v2206_v26   ;;  %v325_v26 = vmul.f32 %v2487_v20, %v2320_v52  ;;  %v2526_v52 = vmul.f32 %v2487_v20, %v2338_v58  ;;  %v2544_v58 = vmul.f32 %v2487_v20, %v2344_v60  ;;  %v463_v60 = vmul.f32 %v2498_v23, %v2377_v32  ;;  %v2578_v32 = vld [vmem:[%s3192_s1 + $0x3] ss:$0 sm:$0xff] }
 0x10c   : > { %v475_v4 = vadd.f32 %v459_v53, %v323_v10  ;;  %v462_v10 = vmul.f32 %v2498_v23, %v2379_v0  ;;  %v594_v53 = vmul.f32 %v2555_v44, %v2418_v43  ;;  %v3252_v0 = vld [vmem:[#allocation26_spill] sm:$0xff]  ;;  %v465_v43 = vmul.f32 %v2498_v23, %v2383_v31 }
 0x10d   : > { %v2489_v21 = vpop.permute.xlu1 %692  ;;  %v464_v31 = vmul.f32 %v2498_v23, %v2385_v33 }
 0x10e   : > { %v2491_v22 = vpop.permute.xlu0 %687  ;;  %1237 = vperm.xlu1 %1897, %v2211_v27   ;;  %v327_v27 = vmul.f32 %v2487_v20, %v2326_v54  ;;  %v2534_v54 = vmul.f32 %v2487_v20, %v2340_v59  ;;  %v460_v59 = vmul.f32 %v2498_v23, %v2373_v63  ;;  %v2569_v63 = vmul.f32 %v2487_v20, %v2346_v61 }
 0x10f   : > { %1232 = vperm.xlu0 %1896, %v2214_v28   ;;  %v326_v28 = vmul.f32 %v2487_v20, %v2328_v55  ;;  %v458_v55 = vmul.f32 %v2498_v23, %v2367_v18  ;;  %v595_v61 = vmul.f32 %v2555_v44, %v2416_v46  ;;  %v731_v46 = vmul.f32 %v2578_v32, %v2462_v7  ;;  %v2605_v7 = vld [vmem:[%s3192_s1 + $0x4] ss:$0 sm:$0xff] }
 0x110   : > { %3248 = vst [vmem:[#allocation39_spill] sm:$0xff] %v2569_v63  ;;  %v481_v33 = vadd.f32 %v465_v43, %v2514_v9  ;;  %v736_v9 = vmul.f32 %v2578_v32, %v2472_v15  ;;  %v601_v15 = vmul.f32 %v2555_v44, %v2434_v47  ;;  %v737_v47 = vmul.f32 %v2578_v32, %v2480_v19 }
 0x111   : > { %v2516_v50 = vpop.permute.xlu1 %702 }
 0x112   : > { %3244 = vst [vmem:[#allocation35_spill] sm:$0xff] %v2516_v50  ;;  %v2518_v8 = vpop.permute.xlu0 %697  ;;  %1247 = vperm.xlu1 %1897, %v2219_v29   ;;  %v337_v29 = vmul.f32 %v2487_v20, %v2359_v2  ;;  %v609_v2 = vmul.f32 %v2555_v44, %v586_v11  ;;  %v3250_v11 = vld [vmem:[#allocation9_spill] sm:$0xff]  ;;  %v488_v50 = vadd.f32 %v472_v57, %v336_v41 }
 0x113   : > { %3245 = vst [vmem:[#allocation36_spill] sm:$0xff] %v2518_v8  ;;  %1242 = vperm.xlu0 %1896, %v2222_v30   ;;  %v461_v30 = vmul.f32 %v2498_v23, %v2371_v34  ;;  %v2573_v8 = vmul.f32 %v2487_v20, %v2350_v62  ;;  %v476_v62 = vadd.f32 %v460_v59, %v324_v24 }
 0x114   : > { %v478_v57 = vadd.f32 %v462_v10, %v326_v28 }
 0x115   : > { %v2563_v18 = vpop.permute.xlu1 %712  ;;  %3249 = vst [vmem:[#allocation40_spill] sm:$0xff] %v2573_v8  ;;  %v477_v63 = vadd.f32 %v461_v30, %v325_v26  ;;  %v479_v8 = vadd.f32 %v463_v60, %v327_v27  ;;  %v611_v27 = vadd.f32 %v595_v61, %v475_v4 }
 0x116   : > { %3246 = vst [vmem:[#allocation37_spill] sm:$0xff] %v2563_v18  ;;  %v2565_v34 = vpop.permute.xlu0 %707  ;;  %1257 = vperm.xlu1 %1897, %v3250_v11   ;;  %v474_v18 = vadd.f32 %v458_v55, %v322_v25  ;;  %v624_v11 = vadd.f32 %v608_v17, %v488_v50  ;;  %v732_v25 = vmul.f32 %v2578_v32, %v2460_v12  ;;  %v3253_v17 = vld [vmem:[#allocation11_spill] sm:$0xff] }
 0x117   : > { %3247 = vst [vmem:[#allocation38_spill] sm:$0xff] %v2565_v34  ;;  %1252 = vperm.xlu0 %1896, %v3251_v35   ;;  %v489_v34 = vadd.f32 %v473_v56, %v337_v29  ;;  %v597_v50 = vmul.f32 %v2555_v44, %v2422_v48  ;;  %v596_v12 = vmul.f32 %v2555_v44, %v2424_v45 }
 0x118   : > { %v610_v29 = vadd.f32 %v594_v53, %v474_v18  ;;  %v748_v59 = vadd.f32 %v732_v25, %v611_v27  ;;  %v734_v48 = vmul.f32 %v2578_v32, %v2466_v13  ;;  %v733_v45 = vmul.f32 %v2578_v32, %v2468_v14  ;;  %v3254_v18 = vld [vmem:[#allocation12_spill] sm:$0xff] }
 0x119   : > { %v625_v20 = vadd.f32 %v609_v2, %v489_v34  ;;  %v723_v55 = vpop.permute.xlu1 %722  ;;  %v613_v34 = vadd.f32 %v597_v50, %v477_v63  ;;  %v612_v4 = vadd.f32 %v596_v12, %v476_v62  ;;  %v599_v13 = vmul.f32 %v2555_v44, %v2428_v42 }
 0x11a   : > { %v718_v56 = vpop.permute.xlu0 %717  ;;  %v746_v26 = vmul.f32 %v2578_v32, %v723_v55  ;;  %1267 = vperm.xlu1 %1897, %v1805_v6   ;;  %v747_v2 = vadd.f32 %v731_v46, %v610_v29  ;;  %v467_v14 = vmul.f32 %v2498_v23, %v2389_v38  ;;  %v598_v35 = vmul.f32 %v2555_v44, %v2430_v39  ;;  %v3255_v55 = vld [vmem:[#allocation13_spill] sm:$0xff]  ;;  %v3257_v29 = vld [vmem:[#allocation15_spill] sm:$0xff] }
 0x11b   : > { %v745_v24 = vmul.f32 %v2578_v32, %v718_v56  ;;  %1262 = vperm.xlu0 %1896, %v3252_v0   ;;  %v480_v53 = vadd.f32 %v464_v31, %v2522_v51  ;;  %v749_v25 = vadd.f32 %v733_v45, %v612_v4  ;;  %v735_v42 = vmul.f32 %v2578_v32, %v2474_v16  ;;  %v3256_v56 = vld [vmem:[#allocation14_spill] sm:$0xff]  ;;  %v3258_v31 = vld [vmem:[#allocation16_spill] sm:$0xff]  ;;  %v3261_v4 = vld [vmem:[#allocation39_spill] sm:$0xff] }
 0x11c   : > { %v2607_v6 = vadd.f32 %v746_v26, %v625_v20  ;;  %v466_v51 = vmul.f32 %v2498_v23, %v2391_v36  ;;  %v615_v46 = vadd.f32 %v599_v13, %v479_v8  ;;  %v600_v26 = vmul.f32 %v2555_v44, %v2436_v1 }
 0x11d   : > { %v2609_v30 = vadd.f32 %v745_v24, %v624_v11  ;;  %v789_v41 = vpop.permute.xlu1 %788  ;;  %v750_v11 = vadd.f32 %v734_v48, %v613_v34  ;;  %v483_v16 = vadd.f32 %v467_v14, %v2526_v52  ;;  %v614_v24 = vadd.f32 %v598_v35, %v478_v57  ;;  %v3260_v34 = vld [vmem:[#allocation18_spill] sm:$0xff] }
 0x11e   : > { %v784_v60 = vpop.permute.xlu0 %783  ;;  %v868_v28 = vmul.f32 %v2605_v7, %v789_v41  ;;  %1333 = vperm.xlu1 %1897, %v3253_v17   ;;  %v469_v27 = vmul.f32 %v2498_v23, %v2395_v40  ;;  %v752_v50 = vadd.f32 %v736_v9, %v615_v46  ;;  %v738_v36 = vmul.f32 %v2578_v32, %v2478_v49  ;;  %v3262_v14 = vld [vmem:[#allocation30_spill] sm:$0xff] }
 0x11f   : > { %v867_v20 = vmul.f32 %v2605_v7, %v784_v60  ;;  %1328 = vperm.xlu0 %1896, %v3254_v18   ;;  %v751_v1 = vadd.f32 %v735_v42, %v614_v24  ;;  %v468_v40 = vmul.f32 %v2498_v23, %v2397_v37  ;;  %v616_v48 = vadd.f32 %v600_v26, %v480_v53 }
 0x120   : > { %v2628_v61 = vadd.f32 %v868_v28, %v748_v59  ;;  %v617_v59 = vadd.f32 %v601_v15, %v481_v33  ;;  %v603_v49 = vmul.f32 %v2555_v44, %v2440_v3  ;;  %v482_v19 = vadd.f32 %v466_v51, %v2534_v54  ;;  %v3259_v33 = vld [vmem:[#allocation17_spill] sm:$0xff] }
 0x121   : > { %v2630_v10 = vadd.f32 %v867_v20, %v747_v2  ;;  %v799_v63 = vpop.permute.xlu1 %798  ;;  %v602_v45 = vmul.f32 %v2555_v44, %v2442_v5  ;;  %v485_v2 = vadd.f32 %v469_v27, %v2544_v58  ;;  %v753_v20 = vadd.f32 %v737_v47, %v616_v48  ;;  %v3268_v27 = vld [vmem:[#allocation19_spill] sm:$0xff] }
 0x122   : > { %v794_v62 = vpop.permute.xlu0 %793  ;;  %v870_v38 = vmul.f32 %v2605_v7, %v799_v63  ;;  %1343 = vperm.xlu1 %1897, %v3255_v55   ;;  %v754_v28 = vadd.f32 %v738_v36, %v617_v59  ;;  %v740_v37 = vmul.f32 %v2578_v32, %v2489_v21  ;;  %v739_v3 = vmul.f32 %v2578_v32, %v2491_v22  ;;  %v3263_v21 = vld [vmem:[#allocation31_spill] sm:$0xff]  ;;  %v3270_v36 = vld [vmem:[#allocation25_spill] sm:$0xff] }
 0x123   : > { %v869_v39 = vmul.f32 %v2605_v7, %v794_v62  ;;  %1338 = vperm.xlu0 %1896, %v3256_v56   ;;  %v484_v58 = vadd.f32 %v468_v40, %v3261_v4  ;;  %v619_v13 = vadd.f32 %v603_v49, %v483_v16  ;;  %v605_v35 = vmul.f32 %v2555_v44, %v3262_v14  ;;  %v3265_v62 = vld [vmem:[#allocation28_spill] sm:$0xff] }
 0x124   : > { %v2648_v0 = vadd.f32 %v870_v38, %v750_v11  ;;  %v604_v53 = vmul.f32 %v2555_v44, %v3263_v21  ;;  %v3264_v11 = vld [vmem:[#allocation27_spill] sm:$0xff]  ;;  %v470_v42 = vmul.f32 %v2498_v23, %v3265_v62  ;;  %v3267_v56 = vld [vmem:[#allocation36_spill] sm:$0xff] }
 0x125   : > { %v2650_v43 = vadd.f32 %v869_v39, %v749_v25  ;;  %v809_v8 = vpop.permute.xlu1 %808  ;;  %v471_v22 = vmul.f32 %v2498_v23, %v3264_v11  ;;  %v618_v25 = vadd.f32 %v602_v45, %v482_v19  ;;  %v756_v38 = vadd.f32 %v740_v37, %v619_v13  ;;  %v3266_v39 = vld [vmem:[#allocation35_spill] sm:$0xff]  ;;  %v3271_v23 = vld [vmem:[#allocation34_spill] sm:$0xff] }
 0x126   : > { %v804_v12 = vpop.permute.xlu0 %803  ;;  %v872_v52 = vmul.f32 %v2605_v7, %v809_v8  ;;  %1353 = vperm.xlu1 %1897, %v3257_v29   ;;  %v742_v55 = vmul.f32 %v2578_v32, %v3266_v39  ;;  %v741_v51 = vmul.f32 %v2578_v32, %v3267_v56  ;;  %v334_v47 = vmul.f32 %v3271_v23, %v3270_v36  ;;  %v3279_v11 = vld [vmem:[#allocation23_spill] sm:$0xff] }
 0x127   : > { %v871_v57 = vmul.f32 %v2605_v7, %v804_v12  ;;  %1348 = vperm.xlu0 %1896, %v3258_v31   ;;  %v755_v26 = vadd.f32 %v739_v3, %v618_v25  ;;  %v621_v8 = vadd.f32 %v605_v35, %v485_v2  ;;  %v620_v12 = vadd.f32 %v604_v53, %v484_v58  ;;  %v3274_v31 = vld [vmem:[#allocation33_spill] sm:$0xff]  ;;  %v1823_v25 = vld [vmem:[%s2110_s9 + $0x112] sm:$0xff] }
 0x128   : > { %v2669_v41 = vadd.f32 %v872_v52, %v752_v50  ;;  %v3269_v50 = vld [vmem:[#allocation20_spill] sm:$0xff]  ;;  %v606_v40 = vmul.f32 %v2555_v44, %v3274_v31  ;;  %v486_v49 = vadd.f32 %v470_v42, %v334_v47 }
 0x129   : > { %v2671_v60 = vadd.f32 %v871_v57, %v751_v1  ;;  %v819_v17 = vpop.permute.xlu1 %818  ;;  %v3272_v1 = vld [vmem:[#allocation32_spill] sm:$0xff]  ;;  %v758_v19 = vadd.f32 %v742_v55, %v621_v8  ;;  %v757_v45 = vadd.f32 %v741_v51, %v620_v12  ;;  %v3281_v51 = vld [vmem:[#allocation29_spill] sm:$0xff] }
 0x12a   : > { %v814_v18 = vpop.permute.xlu0 %813  ;;  %v874_v54 = vmul.f32 %v2605_v7, %v819_v17  ;;  %1363 = vperm.xlu1 %1897, %v3259_v33   ;;  %v607_v52 = vmul.f32 %v2555_v44, %v3272_v1  ;;  %v3273_v57 = vld [vmem:[#allocation40_spill] sm:$0xff]  ;;  %v3276_v17 = vld [vmem:[#allocation38_spill] sm:$0xff] }
 0x12b   : > { %v873_v5 = vmul.f32 %v2605_v7, %v814_v18  ;;  %1358 = vperm.xlu0 %1896, %v3260_v34   ;;  %v487_v29 = vadd.f32 %v471_v22, %v3273_v57  ;;  %v743_v18 = vmul.f32 %v2578_v32, %v3276_v17  ;;  %v622_v34 = vadd.f32 %v606_v40, %v486_v49  ;;  %v3280_v22 = vld [vmem:[#allocation24_spill] sm:$0xff] }
 0x12c   : > { %v2689_v9 = vadd.f32 %v874_v54, %v754_v28  ;;  %v3275_v28 = vld [vmem:[#allocation37_spill] sm:$0xff] }
 0x12d   : > { %v2691_v63 = vadd.f32 %v873_v5, %v753_v20  ;;  %v829_v46 = vpop.permute.xlu1 %828  ;;  %v744_v20 = vmul.f32 %v2578_v32, %v3275_v28  ;;  %v3277_v54 = vld [vmem:[#allocation21_spill] sm:$0xff]  ;;  %v3278_v5 = vld [vmem:[#allocation22_spill] sm:$0xff]  ;;  %v623_v33 = vadd.f32 %v607_v52, %v487_v29  ;;  %v759_v21 = vadd.f32 %v743_v18, %v622_v34 }
 0x12e   : > { %v824_v15 = vpop.permute.xlu0 %823  ;;  %v876_v16 = vmul.f32 %v2605_v7, %v829_v46  ;;  %1373 = vperm.xlu1 %1897, %v3268_v27   ;;  %v1771_v46 = vld [vmem:[%s3192_s1 + $0x5] ss:$0 sm:$0xff] }
 0x12f   : > { %v875_v24 = vmul.f32 %v2605_v7, %v824_v15  ;;  %1368 = vperm.xlu0 %1896, %v3269_v50   ;;  %v760_v13 = vadd.f32 %v744_v20, %v623_v33 }
 0x130   : > { %v2710_v59 = vadd.f32 %v876_v16, %v756_v38 }
 0x131   : > { %v2712_v48 = vadd.f32 %v875_v24, %v755_v26  ;;  %v839_v2 = vpop.permute.xlu1 %838 }
 0x132   : > { %v834_v37 = vpop.permute.xlu0 %833  ;;  %v878_v3 = vmul.f32 %v2605_v7, %v839_v2  ;;  %1383 = vperm.xlu1 %1897, %v3277_v54  }
 0x133   : > { %v877_v44 = vmul.f32 %v2605_v7, %v834_v37  ;;  %1378 = vperm.xlu0 %1896, %v3278_v5  }
 0x134   : > { %v894_v4 = vadd.f32 %v878_v3, %v758_v19 }
 0x135   : > { %v893_v58 = vadd.f32 %v877_v44, %v757_v45  ;;  %v849_v14 = vpop.permute.xlu1 %848 }
 0x136   : > { %v844_v35 = vpop.permute.xlu0 %843  ;;  %v880_v53 = vmul.f32 %v2605_v7, %v849_v14  ;;  %1393 = vperm.xlu1 %1897, %v3279_v11  }
 0x137   : > { %v879_v32 = vmul.f32 %v2605_v7, %v844_v35  ;;  %1388 = vperm.xlu0 %1896, %v3280_v22  }
 0x138   : > { %v896_v62 = vadd.f32 %v880_v53, %v760_v13 }
 0x139   : > { %v895_v42 = vadd.f32 %v879_v32, %v759_v21  ;;  %v859_v38 = vpop.permute.xlu1 %858 }
 0x13a   : > { %v854_v39 = vpop.permute.xlu0 %853  ;;  %v882_v55 = vmul.f32 %v2605_v7, %v859_v38  ;;  %1403 = vperm.xlu1 %1897, %v1823_v25  }
 0x13b   : > { %v881_v56 = vmul.f32 %v2605_v7, %v854_v39  ;;  %1398 = vperm.xlu0 %1896, %v3281_v51  }
 0x13c   : > { %v898_v15 = vadd.f32 %v882_v55, %v2607_v6 }
 0x13d   : > { %v897_v26 = vadd.f32 %v881_v56, %v2609_v30  ;;  %v925_v16 = vpop.permute.xlu1 %924 }
 0x13e   : > { %v920_v24 = vpop.permute.xlu0 %919  ;;  %v1004_v27 = vmul.f32 %v1771_v46, %v925_v16 }
 0x13f   : > { %v1003_v50 = vmul.f32 %v1771_v46, %v920_v24 }
 0x140   : > { %v2736_v36 = vadd.f32 %v1004_v27, %v2628_v61 }
 0x141   : > { %v2739_v7 = vadd.f32 %v1003_v50, %v2630_v10  ;;  %v935_v23 = vpop.permute.xlu1 %934 }
 0x142   : > { %v930_v47 = vpop.permute.xlu0 %929  ;;  %v1006_v8 = vmul.f32 %v1771_v46, %v935_v23 }
 0x143   : > { %v1005_v12 = vmul.f32 %v1771_v46, %v930_v47 }
 0x144   : > { %v2742_v1 = vadd.f32 %v1006_v8, %v2648_v0 }
 0x145   : > { %v2745_v6 = vadd.f32 %v1005_v12, %v2650_v43  ;;  %v945_v30 = vpop.permute.xlu1 %944 }
 0x146   : > { %v940_v52 = vpop.permute.xlu0 %939  ;;  %v1008_v57 = vmul.f32 %v1771_v46, %v945_v30 }
 0x147   : > { %v1007_v29 = vmul.f32 %v1771_v46, %v940_v52 }
 0x148   : > { %v2748_v61 = vadd.f32 %v1008_v57, %v2669_v41 }
 0x149   : > { %v2751_v10 = vadd.f32 %v1007_v29, %v2671_v60  ;;  %v955_v31 = vpop.permute.xlu1 %954 }
 0x14a   : > { %v950_v40 = vpop.permute.xlu0 %949  ;;  %v1010_v49 = vmul.f32 %v1771_v46, %v955_v31  ;;  %v2808_v31 = vld [vmem:[%s3192_s1 + $0x6] ss:$0 sm:$0xff] }
 0x14b   : > { %v1009_v19 = vmul.f32 %v1771_v46, %v950_v40 }
 0x14c   : > { %v2754_v0 = vadd.f32 %v1010_v49, %v2689_v9 }
 0x14d   : > { %v2757_v43 = vadd.f32 %v1009_v19, %v2691_v63  ;;  %v965_v45 = vpop.permute.xlu1 %964  ;;  %v2817_v19 = vld [vmem:[%s3192_s1 + $0x7] ss:$0 sm:$0xff] }
 0x14e   : > { %v960_v28 = vpop.permute.xlu0 %959  ;;  %v1012_v20 = vmul.f32 %v1771_v46, %v965_v45 }
 0x14f   : > { %v1011_v2 = vmul.f32 %v1771_v46, %v960_v28 }
 0x150   : > { %v2760_v41 = vadd.f32 %v1012_v20, %v2710_v59 }
 0x151   : > { %v2763_v60 = vadd.f32 %v1011_v2, %v2712_v48  ;;  %v975_v37 = vpop.permute.xlu1 %974 }
 0x152   : > { %v970_v17 = vpop.permute.xlu0 %969  ;;  %v1014_v18 = vmul.f32 %v1771_v46, %v975_v37 }
 0x153   : > { %v1013_v3 = vmul.f32 %v1771_v46, %v970_v17 }
 0x154   : > { %v2765_v44 = vadd.f32 %v1014_v18, %v894_v4 }
 0x155   : > { %v2767_v9 = vadd.f32 %v1013_v3, %v893_v58  ;;  %v985_v63 = vpop.permute.xlu1 %984 }
 0x156   : > { %v980_v54 = vpop.permute.xlu0 %979  ;;  %v1016_v5 = vmul.f32 %v1771_v46, %v985_v63  ;;  %v2832_v63 = vld [vmem:[%s3192_s1 + $0x8] ss:$0 sm:$0xff] }
 0x157   : > { %v1015_v33 = vmul.f32 %v1771_v46, %v980_v54 }
 0x158   : > { %v2769_v34 = vadd.f32 %v1016_v5, %v896_v62 }
 0x159   : > { %v2771_v13 = vadd.f32 %v1015_v33, %v895_v42  ;;  %v995_v59 = vpop.permute.xlu1 %994 }
 0x15a   : > { %v990_v14 = vpop.permute.xlu0 %989  ;;  %v1018_v48 = vmul.f32 %v1771_v46, %v995_v59 }
 0x15b   : > { %v1017_v35 = vmul.f32 %v1771_v46, %v990_v14 }
 0x15c   : > { %v2773_v21 = vadd.f32 %v1018_v48, %v898_v15 }
 0x15d   : > { %v2775_v53 = vadd.f32 %v1017_v35, %v897_v26  ;;  %v1062_v4 = vpop.permute.xlu1 %1061 }
 0x15e   : > { %v1057_v32 = vpop.permute.xlu0 %1056  ;;  %v1141_v45 = vmul.f32 %v2808_v31, %v1062_v4 }
 0x15f   : > { %v1140_v28 = vmul.f32 %v2808_v31, %v1057_v32 }
 0x160   : > { %v1157_v54 = vadd.f32 %v1141_v45, %v2736_v36 }
 0x161   : > { %v1072_v58 = vpop.permute.xlu1 %1071  ;;  %v1156_v5 = vadd.f32 %v1140_v28, %v2739_v7 }
 0x162   : > { %v1067_v11 = vpop.permute.xlu0 %1066  ;;  %v1143_v18 = vmul.f32 %v2808_v31, %v1072_v58 }
 0x163   : > { %v1142_v3 = vmul.f32 %v2808_v31, %v1067_v11 }
 0x164   : > { %v1159_v11 = vadd.f32 %v1143_v18, %v2742_v1 }
 0x165   : > { %v1082_v22 = vpop.permute.xlu1 %1081  ;;  %v1158_v36 = vadd.f32 %v1142_v3, %v2745_v6 }
 0x166   : > { %v1077_v25 = vpop.permute.xlu0 %1076  ;;  %v1145_v7 = vmul.f32 %v2808_v31, %v1082_v22 }
 0x169   : > { %v2777_v38 = vpop.permute.xlu1 %1091 }
 0x16a   : > { %v2779_v62 = vpop.permute.xlu0 %1086 }
 0x16d   : > { %v2781_v42 = vpop.permute.xlu1 %1101 }
 0x16e   : > { %v2783_v39 = vpop.permute.xlu0 %1096 }
 0x171   : > { %v2785_v55 = vpop.permute.xlu1 %1111 }
 0x172   : > { %v2787_v56 = vpop.permute.xlu0 %1106 }
 0x175   : > { %v2789_v51 = vpop.permute.xlu1 %1121 }
 0x176   : > { %v2791_v46 = vpop.permute.xlu0 %1116 }
 0x179   : > { %v2793_v15 = vpop.permute.xlu1 %1131 }
 0x17a   : > { %v2795_v26 = vpop.permute.xlu0 %1126 }
 0x17d   : > { %v1198_v16 = vpop.permute.xlu1 %1197 }
 0x17e   : > { %v1193_v24 = vpop.permute.xlu0 %1192  ;;  %v1277_v37 = vmul.f32 %v2817_v19, %v1198_v16  ;;  %v1144_v16 = vmul.f32 %v2808_v31, %v1077_v25 }
 0x17f   : > { %v1276_v17 = vmul.f32 %v2817_v19, %v1193_v24  ;;  %v2850_v24 = vld [vmem:[%s3193_s2] ss:$0 sm:$0xff] }
 0x180   : > { %v1293_v35 = vadd.f32 %v1277_v37, %v1157_v54  ;;  %v1161_v54 = vadd.f32 %v1145_v7, %v2748_v61 }
 0x181   : > { %v1208_v27 = vpop.permute.xlu1 %1207  ;;  %v1292_v4 = vadd.f32 %v1276_v17, %v1156_v5  ;;  %v1160_v5 = vadd.f32 %v1144_v16, %v2751_v10 }
 0x182   : > { %v1203_v50 = vpop.permute.xlu0 %1202  ;;  %v1279_v33 = vmul.f32 %v2817_v19, %v1208_v27 }
 0x183   : > { %v1278_v59 = vmul.f32 %v2817_v19, %v1203_v50 }
 0x184   : > { %v1295_v45 = vadd.f32 %v1279_v33, %v1159_v11 }
 0x185   : > { %v1218_v23 = vpop.permute.xlu1 %1217  ;;  %v1294_v28 = vadd.f32 %v1278_v59, %v1158_v36 }
 0x186   : > { %v1213_v47 = vpop.permute.xlu0 %1212  ;;  %v1281_v37 = vmul.f32 %v2817_v19, %v1218_v23  ;;  %v1147_v23 = vmul.f32 %v2808_v31, %v2777_v38 }
 0x187   : > { %v1280_v1 = vmul.f32 %v2817_v19, %v1213_v47  ;;  %v1146_v47 = vmul.f32 %v2808_v31, %v2779_v62 }
 0x188   : > { %v1297_v10 = vadd.f32 %v1281_v37, %v1161_v54  ;;  %v1163_v11 = vadd.f32 %v1147_v23, %v2754_v0 }
 0x189   : > { %v1228_v8 = vpop.permute.xlu1 %1227  ;;  %v1296_v59 = vadd.f32 %v1280_v1, %v1160_v5  ;;  %v1162_v36 = vadd.f32 %v1146_v47, %v2757_v43 }
 0x18a   : > { %v1223_v12 = vpop.permute.xlu0 %1222  ;;  %v1283_v38 = vmul.f32 %v2817_v19, %v1228_v8  ;;  %v1149_v8 = vmul.f32 %v2808_v31, %v2781_v42 }
 0x18b   : > { %v1282_v62 = vmul.f32 %v2817_v19, %v1223_v12  ;;  %v1148_v12 = vmul.f32 %v2808_v31, %v2783_v39 }
 0x18d   : > { %v2797_v30 = vpop.permute.xlu1 %1237  ;;  %v1298_v0 = vadd.f32 %v1282_v62, %v1162_v36 }
 0x18e   : > { %v2799_v52 = vpop.permute.xlu0 %1232  ;;  %v1285_v43 = vmul.f32 %v2817_v19, %v2797_v30  ;;  %v1151_v30 = vmul.f32 %v2808_v31, %v2785_v55 }
 0x18f   : > { %v1284_v42 = vmul.f32 %v2817_v19, %v2799_v52  ;;  %v1150_v52 = vmul.f32 %v2808_v31, %v2787_v56 }
 0x191   : > { %v2801_v57 = vpop.permute.xlu1 %1247 }
 0x192   : > { %v2803_v29 = vpop.permute.xlu0 %1242 }
 0x193   : > { %v1286_v55 = vmul.f32 %v2817_v19, %v2803_v29  ;;  %v1152_v29 = vmul.f32 %v2808_v31, %v2791_v46 }
 0x195   : > { %v2810_v40 = vpop.permute.xlu1 %1257 }
 0x196   : > { %v2812_v49 = vpop.permute.xlu0 %1252 }
 0x199   : > { %v2821_v20 = vpop.permute.xlu1 %1267 }
 0x19a   : > { %v2823_v2 = vpop.permute.xlu0 %1262 }
 0x19d   : > { %v1334_v14 = vpop.permute.xlu1 %1333 }
 0x19e   : > { %v1329_v48 = vpop.permute.xlu0 %1328  ;;  %v1413_v32 = vmul.f32 %v2832_v63, %v1334_v14 }
 0x19f   : > { %v1412_v58 = vmul.f32 %v2832_v63, %v1329_v48 }
 0x1a0   : > { %v1429_v27 = vadd.f32 %v1413_v32, %v1293_v35 }
 0x1a1   : > { %v1428_v50 = vadd.f32 %v1412_v58, %v1292_v4  ;;  %v1344_v17 = vpop.permute.xlu1 %1343 }
 0x1a2   : > { %v1339_v6 = vpop.permute.xlu0 %1338  ;;  %v2855_v22 = vadd.f32 %v2850_v24, %v1429_v27  ;;  %v1415_v18 = vmul.f32 %v2832_v63, %v1344_v17  ;;  %v1299_v27 = vadd.f32 %v1283_v38, %v1163_v11  ;;  %v1165_v17 = vadd.f32 %v1149_v8, %v2760_v41 }
 0x1a3   : > { %v2858_v25 = vadd.f32 %v2850_v24, %v1428_v50  ;;  %v1414_v3 = vmul.f32 %v2832_v63, %v1339_v6  ;;  %v1164_v6 = vadd.f32 %v1148_v12, %v2763_v60  ;;  %v1287_v60 = vmul.f32 %v2817_v19, %v2801_v57 }
 0x1a4   : > { %1469 = vst.msk [vmem:[%s2868_s16 + $0x8] sm:$0xff] %vm1467_vm0, %v2855_v22  ;;  %v1431_v33 = vadd.f32 %v1415_v18, %v1295_v45  ;;  %v1301_v54 = vadd.f32 %v1285_v43, %v1165_v17  ;;  %v1153_v57 = vmul.f32 %v2808_v31, %v2789_v51  ;;  %v1288_v51 = vmul.f32 %v2817_v19, %v2812_v49 }
 0x1a5   : > { %1468 = vst.msk [vmem:[%s2868_s16] sm:$0xff] %vm1467_vm0, %v2858_v25  ;;  %v1430_v61 = vadd.f32 %v1414_v3, %v1294_v28  ;;  %v1354_v14 = vpop.permute.xlu1 %1353  ;;  %v1300_v41 = vadd.f32 %v1284_v42, %v1164_v6  ;;  %v1168_v12 = vadd.f32 %v1152_v29, %v2771_v13  ;;  %v1154_v49 = vmul.f32 %v2808_v31, %v2795_v26 }
 0x1a6   : > { %v1349_v48 = vpop.permute.xlu0 %1348  ;;  %v2879_v35 = vadd.f32 %v2850_v24, %v1431_v33  ;;  %v1417_v32 = vmul.f32 %v2832_v63, %v1354_v14  ;;  %v1169_v8 = vadd.f32 %v1153_v57, %v2769_v34  ;;  %v1291_v13 = vmul.f32 %v2817_v19, %v2821_v20 }
 0x1a7   : > { %v2882_v4 = vadd.f32 %v2850_v24, %v1430_v61  ;;  %v1416_v58 = vmul.f32 %v2832_v63, %v1349_v48  ;;  %v1304_v34 = vadd.f32 %v1288_v51, %v1168_v12  ;;  %v1170_v20 = vadd.f32 %v1154_v49, %v2775_v53 }
 0x1a8   : > { %1471 = vst.msk [vmem:[%s2868_s16 + $0x18] sm:$0xff] %vm1467_vm0, %v2879_v35  ;;  %v1433_v7 = vadd.f32 %v1417_v32, %v1297_v10  ;;  %v1167_v10 = vadd.f32 %v1151_v30, %v2765_v44 }
 0x1a9   : > { %1470 = vst.msk [vmem:[%s2868_s16 + $0x10] sm:$0xff] %vm1467_vm0, %v2882_v4  ;;  %v1432_v16 = vadd.f32 %v1416_v58, %v1296_v59  ;;  %v1364_v50 = vpop.permute.xlu1 %1363  ;;  %v1166_v59 = vadd.f32 %v1150_v52, %v2767_v9  ;;  %v1289_v9 = vmul.f32 %v2817_v19, %v2810_v40  ;;  %v1155_v40 = vmul.f32 %v2808_v31, %v2793_v15 }
 0x1aa   : > { %v1359_v39 = vpop.permute.xlu0 %1358  ;;  %v2903_v45 = vadd.f32 %v2850_v24, %v1433_v7  ;;  %v1419_v37 = vmul.f32 %v2832_v63, %v1364_v50  ;;  %v1303_v14 = vadd.f32 %v1287_v60, %v1167_v10  ;;  %v1290_v15 = vmul.f32 %v2817_v19, %v2823_v2 }
 0x1ab   : > { %v2906_v28 = vadd.f32 %v2850_v24, %v1432_v16  ;;  %v1418_v1 = vmul.f32 %v2832_v63, %v1359_v39  ;;  %v1302_v44 = vadd.f32 %v1286_v55, %v1166_v59  ;;  %v1171_v39 = vadd.f32 %v1155_v40, %v2773_v21 }
 0x1ac   : > { %1473 = vst.msk [vmem:[%s2868_s16 + $0x28] sm:$0xff] %vm1467_vm0, %v2903_v45  ;;  %v1435_v18 = vadd.f32 %v1419_v37, %v1299_v27  ;;  %v1305_v27 = vadd.f32 %v1289_v9, %v1169_v8 }
 0x1ad   : > { %1472 = vst.msk [vmem:[%s2868_s16 + $0x20] sm:$0xff] %vm1467_vm0, %v2906_v28  ;;  %v1434_v3 = vadd.f32 %v1418_v1, %v1298_v0  ;;  %v1374_v5 = vpop.permute.xlu1 %1373  ;;  %v1307_v37 = vadd.f32 %v1291_v13, %v1171_v39  ;;  %v1306_v1 = vadd.f32 %v1290_v15, %v1170_v20 }
 0x1ae   : > { %v1369_v56 = vpop.permute.xlu0 %1368  ;;  %v2927_v23 = vadd.f32 %v2850_v24, %v1435_v18  ;;  %v1421_v33 = vmul.f32 %v2832_v63, %v1374_v5 }
 0x1af   : > { %v2930_v47 = vadd.f32 %v2850_v24, %v1434_v3  ;;  %v1420_v61 = vmul.f32 %v2832_v63, %v1369_v56 }
 0x1b0   : > { %1475 = vst.msk [vmem:[%s2868_s16 + $0x38] sm:$0xff] %vm1467_vm0, %v2927_v23  ;;  %v1437_v38 = vadd.f32 %v1421_v33, %v1301_v54 }
 0x1b1   : > { %1474 = vst.msk [vmem:[%s2868_s16 + $0x30] sm:$0xff] %vm1467_vm0, %v2930_v47  ;;  %v1436_v62 = vadd.f32 %v1420_v61, %v1300_v41  ;;  %v1384_v48 = vpop.permute.xlu1 %1383 }
 0x1b2   : > { %v1379_v46 = vpop.permute.xlu0 %1378  ;;  %v2951_v32 = vadd.f32 %v2850_v24, %v1437_v38  ;;  %v1423_v11 = vmul.f32 %v2832_v63, %v1384_v48 }
 0x1b3   : > { %v2954_v58 = vadd.f32 %v2850_v24, %v1436_v62  ;;  %v1422_v36 = vmul.f32 %v2832_v63, %v1379_v46 }
 0x1b4   : > { %1477 = vst.msk [vmem:[%s2868_s16 + $0x48] sm:$0xff] %vm1467_vm0, %v2951_v32  ;;  %v1439_v7 = vadd.f32 %v1423_v11, %v1303_v14 }
 0x1b5   : > { %1476 = vst.msk [vmem:[%s2868_s16 + $0x40] sm:$0xff] %vm1467_vm0, %v2954_v58  ;;  %v1438_v16 = vadd.f32 %v1422_v36, %v1302_v44  ;;  %v1394_v0 = vpop.permute.xlu1 %1393 }
 0x1b6   : > { %v1389_v26 = vpop.permute.xlu0 %1388  ;;  %v2975_v31 = vadd.f32 %v2850_v24, %v1439_v7  ;;  %v1425_v42 = vmul.f32 %v2832_v63, %v1394_v0 }
 0x1b7   : > { %v2978_v43 = vadd.f32 %v2850_v24, %v1438_v16  ;;  %v1424_v50 = vmul.f32 %v2832_v63, %v1389_v26 }
 0x1b8   : > { %1479 = vst.msk [vmem:[%s2868_s16 + $0x58] sm:$0xff] %vm1467_vm0, %v2975_v31  ;;  %v1441_v19 = vadd.f32 %v1425_v42, %v1305_v27 }
 0x1b9   : > { %1478 = vst.msk [vmem:[%s2868_s16 + $0x50] sm:$0xff] %vm1467_vm0, %v2978_v43  ;;  %v1440_v2 = vadd.f32 %v1424_v50, %v1304_v34  ;;  %v1404_v17 = vpop.permute.xlu1 %1403 }
 0x1ba   : > { %v1399_v6 = vpop.permute.xlu0 %1398  ;;  %v2991_v30 = vadd.f32 %v2850_v24, %v1441_v19  ;;  %v1427_v53 = vmul.f32 %v2832_v63, %v1404_v17 }
 0x1bb   : > { %v2994_v21 = vadd.f32 %v2850_v24, %v1440_v2  ;;  %v1426_v52 = vmul.f32 %v2832_v63, %v1399_v6  ;;  %1487 = sbr.rel (%p1827_p11) target bundleno = 450 (0x1c2), region = 36  ;;  %v2019_v63 = vmov (!%p1827_p11), 0.0  }
 0x1bc   : > { %1481 = vst.msk [vmem:[%s2868_s16 + $0x68] sm:$0xff] %vm1467_vm0, %v2991_v30  ;;  %v1443_v18 = vadd.f32 %v1427_v53, %v1307_v37 }
 0x1bd   : > { %1480 = vst.msk [vmem:[%s2868_s16 + $0x60] sm:$0xff] %vm1467_vm0, %v2994_v21  ;;  %v1442_v3 = vadd.f32 %v1426_v52, %v1306_v1 }
 0x1be   : > { %v3005_v54 = vadd.f32 %v2850_v24, %v1443_v18  ;;  %1489 = vst.msk [vmem:[#allocation4] sm:$0x1] (!%p1827_p11), %vm1488_vm1, %v2019_v63  ;;  %1490 = vst.msk [vmem:[#allocation6] sm:$0x1] (!%p1827_p11), %vm1488_vm1, %v2019_v63 }
 0x1bf   : > { %v3008_v41 = vadd.f32 %v2850_v24, %v1442_v3 }
 0x1c0   : > { %1483 = vst.msk [vmem:[%s2868_s16 + $0x78] sm:$0xff] %vm1467_vm0, %v3005_v54 }
 0x1c1   : > { %1482 = vst.msk [vmem:[%s2868_s16 + $0x70] sm:$0xff] %vm1467_vm0, %v3008_v41 }
 0x1c2 PF: > { %v1492_v24 = vsel %vm1467_vm0, %v2858_v25, 0.0  ;;  %v1493_v60 = vsel %vm1467_vm0, %v2855_v22, 0.0  ;;  %v1495_v55 = vsel %vm1467_vm0, %v2882_v4, 0.0  ;;  %v1497_v56 = vsel %vm1467_vm0, %v2879_v35, 0.0  ;;  %s1837_s17 = sshll.u32 %s2076_s22, 11  ;;  %s1602_s30 = sshll.u32 %s2868_s16, 4  ;;  %s3042_s30 = int_to_ptr.vmem [resolvable:$true] %s1602_s30 }
 0x1c3   : > { %v1494_v5 = vadd.f32 %v1493_v60, %v1492_v24  ;;  %v1499_v61 = vsel %vm1467_vm0, %v2906_v28, 0.0  ;;  %s3031_s26 = scalar_lea.hbm %s3194_s3, %s1837_s17  ;;  %v1533_v59 = vmul.f32 %v2858_v25, %v2858_v25  ;;  %v1534_v57 = vmul.f32 %v2855_v22, %v2855_v22  ;;  %s3048_s6 = scalar_lea.sflag [#allocation3], %s207_s12 }
 0x1c4   : > { %v1501_v29 = vsel %vm1467_vm0, %v2903_v45, 0.0  ;;  %v1535_v38 = vmul.f32 %v2882_v4, %v2882_v4  ;;  %v1536_v14 = vmul.f32 %v2879_v35, %v2879_v35  ;;  %s1898_s7 = scalar_lea.vmem %s3042_s30, 2048  ;;  %s2020_s8 = smov [#allocation2]  }
 0x1c5   : > { %v1496_v33 = vadd.f32 %v1495_v55, %v1494_v5  ;;  %p1899_p12 = scmp.ne.s32.totalorder %s3042_s30, %s1898_s7  ;;  %s1902_s9 = sshll.u32 %s2020_s8, 4  ;;  %s1903_s9 = int_to_ptr.vmem [resolvable:$false] %s1902_s9 }
 0x1c6   : > { %s1904_s10 = scalar_lea.vmem %s1903_s9, 4096  ;;  %p1905_p1 = scmp.lt.s32.totalorder %s3042_s30, %s1903_s9 }
 0x1c7   : > { %v1498_v10 = vadd.f32 %v1497_v56, %v1496_v33  ;;  %p1900_p13 = pnand %p1899_p12, %p2095_p5  ;;  %p1906_p3 = scmp.lt.s32.totalorder %s1904_s10, %s1898_s7 }
 0x1c9   : > { %v1500_v62 = vadd.f32 %v1499_v61, %v1498_v10  ;;  %p1901_p0 = pneg %p1900_p13  ;;  %p1907_p4 = por %p1906_p3, %p1905_p1 }
 0x1cb   : > { %p1908_p7 = pnand %p1907_p4, %p1901_p0 }
 0x1cd   : > { %1911 = shalt.err (!%p1908_p7)
}
 0x1ce   : > { %s1912_s11 = scalar_lea.hbm %s3031_s26, 2048  ;;  %s1916_s14 = scalar_lea.hbm %s3194_s3, 4096 }
 0x1cf   : > { %p1913_p8 = scmp.ne.s32.totalorder %s3031_s26, %s1912_s11  ;;  %p1917_p11 = scmp.lt.u32.totalorder %s3031_s26, %s3194_s3 }
 0x1d0   : > { %p1918_p12 = scmp.lt.u32.totalorder %s1916_s14, %s1912_s11  ;;  %p1920_p0 = scmp.lt.u32.totalorder %s1912_s11, %s3031_s26 }
 0x1d1   : > { %p1914_p9 = pnand %p1913_p8, %p2095_p5 }
 0x1d2   : > { %p1919_p13 = por %p1918_p12, %p1917_p11 }
 0x1d3   : > { %p1915_p10 = pneg %p1914_p9 }
 0x1d4   : > { %p1921_p1 = por %p1920_p0, %p1919_p13 }
 0x1d6   : > { %p1922_p3 = pnand %p1921_p1, %p1915_p10 }
 0x1d8   : > { %1925 = shalt.err (!%p1922_p3)
}
 0x1d9   : > { %s2021_s17 = smov 128   ;;  %s2022_s23 = smov 8   ;;  %v1503_v22 = vsel %vm1467_vm0, %v2930_v47, 0.0  ;;  %v1502_v25 = vadd.f32 %v1501_v29, %v1500_v62  ;;  %v1537_v35 = vmul.f32 %v2906_v28, %v2906_v28  ;;  %v1549_v4 = vsel %vm1467_vm0, %v1533_v59, 0.0 }
 0x1da   : > { %1839 = dma.vmem_to_hbm [thread:$0]  (%p2095_p5), %s3042_s30, 2048, %s3031_s26, %s3048_s6, %s2021_s17, %s2021_s17, %s2022_s23   ;;  %v1550_v44 = vsel %vm1467_vm0, %v1534_v57, 0.0  ;;  %v1505_v9 = vsel %vm1467_vm0, %v2927_v23, 0.0  ;;  %v1552_v48 = vsel %vm1467_vm0, %v1535_v38, 0.0  ;;  %v1538_v11 = vmul.f32 %v2903_v45, %v2903_v45 }
 0x1db   : > { %v1551_v51 = vadd.f32 %v1550_v44, %v1549_v4  ;;  %v1504_v46 = vadd.f32 %v1503_v22, %v1502_v25  ;;  %v1554_v36 = vsel %vm1467_vm0, %v1536_v14, 0.0  ;;  %v1507_v8 = vsel %vm1467_vm0, %v2954_v58, 0.0  ;;  %s2023_s28 = smov [#allocation4]  }
 0x1dc   : > { %v1539_v40 = vmul.f32 %v2930_v47, %v2930_v47  ;;  %v1556_v49 = vsel %vm1467_vm0, %v1537_v35, 0.0  ;;  %v1509_v7 = vsel %vm1467_vm0, %v2951_v32, 0.0  ;;  %v1540_v45 = vmul.f32 %v2927_v23, %v2927_v23  ;;  %s1616_s25 = sshll.u32 %s2023_s28, 4  ;;  %s1617_s25 = int_to_ptr.vmem [resolvable:$true] %s1616_s25 }
 0x1dd   : > { %v1553_v28 = vadd.f32 %v1552_v48, %v1551_v51  ;;  %v1506_v12 = vadd.f32 %v1505_v9, %v1504_v46  ;;  %v1558_v34 = vsel %vm1467_vm0, %v1538_v11, 0.0  ;;  %v1511_v13 = vsel %vm1467_vm0, %v2978_v43, 0.0  ;;  %v1491_v51 = vld [vmem:[#allocation4] sm:$0x1]  ;;  %s1926_s26 = scalar_lea.vmem %s1617_s25, 16  ;;  %s1932_s30 = scalar_lea.vmem %s1617_s25, 32 }
 0x1de   : > { %v1541_v47 = vmul.f32 %v2954_v58, %v2954_v58  ;;  %v1560_v26 = vsel %vm1467_vm0, %v1539_v40, 0.0  ;;  %v1513_v42 = vsel %vm1467_vm0, %v2975_v31, 0.0  ;;  %v1542_v23 = vmul.f32 %v2951_v32, %v2951_v32  ;;  %p1927_p5 = scmp.ne.s32.totalorder %s1617_s25, %s1926_s26  ;;  %p1933_p8 = scmp.lt.s32.totalorder %s1617_s25, %s1617_s25 }
 0x1df   : > { %v1555_v16 = vadd.f32 %v1554_v36, %v1553_v28  ;;  %v1508_v27 = vadd.f32 %v1507_v8, %v1506_v12  ;;  %v1562_v20 = vsel %vm1467_vm0, %v1540_v45, 0.0  ;;  %v1515_v19 = vsel %vm1467_vm0, %v2994_v21, 0.0  ;;  %p1934_p9 = scmp.lt.s32.totalorder %s1932_s30, %s1926_s26 }
 0x1e0   : > { %v1543_v58 = vmul.f32 %v2978_v43, %v2978_v43  ;;  %v1564_v1 = vsel %vm1467_vm0, %v1541_v47, 0.0  ;;  %v1517_v17 = vsel %vm1467_vm0, %v2991_v30, 0.0  ;;  %v1544_v32 = vmul.f32 %v2975_v31, %v2975_v31  ;;  %p1928_p4 = pnand %p1927_p5, %p106_p2 }
 0x1e1   : > { %v1557_v15 = vadd.f32 %v1556_v49, %v1555_v16  ;;  %v1510_v0 = vadd.f32 %v1509_v7, %v1508_v27  ;;  %v1566_v52 = vsel %vm1467_vm0, %v1542_v23, 0.0  ;;  %v1519_v18 = vsel %vm1467_vm0, %v3008_v41, 0.0  ;;  %p1935_p10 = por %p1934_p9, %p1933_p8 }
 0x1e2   : > { %v1545_v43 = vmul.f32 %v2994_v21, %v2994_v21  ;;  %v1568_v24 = vsel %vm1467_vm0, %v1543_v58, 0.0  ;;  %v1521_v60 = vsel %vm1467_vm0, %v3005_v54, 0.0  ;;  %v1546_v31 = vmul.f32 %v2991_v30, %v2991_v30  ;;  %p1929_p7 = pneg %p1928_p4 }
 0x1e3   : > { %v1559_v50 = vadd.f32 %v1558_v34, %v1557_v15  ;;  %v1512_v39 = vadd.f32 %v1511_v13, %v1510_v0  ;;  %v1570_v56 = vsel %vm1467_vm0, %v1544_v32, 0.0  ;;  %v1547_v10 = vmul.f32 %v3008_v41, %v3008_v41 }
 0x1e4   : > { %v1572_v59 = vsel %vm1467_vm0, %v1545_v43, 0.0  ;;  %v1548_v29 = vmul.f32 %v3005_v54, %v3005_v54  ;;  %v1574_v38 = vsel %vm1467_vm0, %v1546_v31, 0.0  ;;  %vm1530_vm2 = vcmask 516096   ;;  %p1936_p11 = pnand %p1935_p10, %p1929_p7 }
 0x1e5   : > { %v1561_v2 = vadd.f32 %v1560_v26, %v1559_v50  ;;  %v1514_v37 = vadd.f32 %v1513_v42, %v1512_v39  ;;  %v1576_v30 = vsel %vm1467_vm0, %v1547_v10, 0.0 }
 0x1e6   : > { %v1578_v35 = vsel %vm1467_vm0, %v1548_v29, 0.0 }
 0x1e7   : > { %v1563_v6 = vadd.f32 %v1562_v20, %v1561_v2  ;;  %v1516_v53 = vadd.f32 %v1515_v19, %v1514_v37 }
 0x1e9   : > { %v1565_v3 = vadd.f32 %v1564_v1, %v1563_v6  ;;  %v1518_v63 = vadd.f32 %v1517_v17, %v1516_v53 }
 0x1eb   : > { %v1567_v55 = vadd.f32 %v1566_v52, %v1565_v3  ;;  %v1520_v5 = vadd.f32 %v1519_v18, %v1518_v63 }
 0x1ed   : > { %v1569_v33 = vadd.f32 %v1568_v24, %v1567_v55  ;;  %v1522_v61 = vadd.f32 %v1521_v60, %v1520_v5 }
 0x1ef   : > { %v1571_v21 = vadd.f32 %v1570_v56, %v1569_v33  ;;  %v1523_v57 = vrot.slane %v1522_v61, 4 }
 0x1f1   : > { %v1573_v62 = vadd.f32 %v1572_v59, %v1571_v21  ;;  %v1524_v14 = vadd.f32 %v1523_v57, %v1522_v61 }
 0x1f3   : > { %v1575_v22 = vadd.f32 %v1574_v38, %v1573_v62  ;;  %v1525_v25 = vrot.slane %v1524_v14, 2 }
 0x1f5   : > { %v1577_v4 = vadd.f32 %v1576_v30, %v1575_v22  ;;  %v1526_v44 = vadd.f32 %v1525_v25, %v1524_v14 }
 0x1f7   : > { %v1579_v41 = vadd.f32 %v1578_v35, %v1577_v4  ;;  %v1527_v9 = vrot.slane %v1526_v44, 1 }
 0x1f9   : > { %v1580_v48 = vrot.slane %v1579_v41, 4  ;;  %v1528_v54 = vadd.f32 %v1527_v9, %v1526_v44 }
 0x1fb   : > { %v1581_v46 = vadd.f32 %v1580_v48, %v1579_v41  ;;  %v1529_v11 = vadd.f32 %v1528_v54, %v1491_v51 }
 0x1fd   : > { %v1582_v36 = vrot.slane %v1581_v46, 2  ;;  %1531 = vst.msk [vmem:[#allocation4] sm:$0x1] %vm1530_vm2, %v1529_v11 }
 0x1ff   : > { %v1583_v8 = vadd.f32 %v1582_v36, %v1581_v46 }
 0x200   : > { %1939 = shalt.err (!%p1936_p11)
}
 0x201   : > { %s1940_s8 = scalar_lea.hbm %s3195_s4, 16 }
 0x202   : > { %p1941_p12 = scmp.ne.s32.totalorder %s3195_s4, %s1940_s8  ;;  %p1946_p1 = scmp.lt.u32.totalorder %s1940_s8, %s3195_s4 }
 0x204   : > { %p1942_p13 = pnand %p1941_p12, %p106_p2 }
 0x206   : > { %p1943_p0 = pneg %p1942_p13 }
 0x208   : > { %p1948_p3 = pnand %p1946_p1, %p1943_p0 }
 0x20a   : > { %1951 = shalt.err (!%p1948_p3)
}
 0x20b   : > { %1841 = dma.vmem_to_hbm [thread:$0]  (%p106_p2), %s1617_s25, 16, %s3195_s4, [#allocation5]   ;;  %v1584_v28 = vrot.slane %v1583_v8, 1  ;;  %v1532_v12 = vld [vmem:[#allocation6] sm:$0x1] }
 0x20c   : > { %s2024_s15 = smov [#allocation6]  }
 0x20d   : > { %s1627_s16 = sshll.u32 %s2024_s15, 4  ;;  %v1585_v40 = vadd.f32 %v1584_v28, %v1583_v8  ;;  %s1628_s16 = int_to_ptr.vmem [resolvable:$true] %s1627_s16 }
 0x20e   : > { %s1952_s17 = scalar_lea.vmem %s1628_s16, 16  ;;  %s1958_s23 = scalar_lea.vmem %s1628_s16, 32 }
 0x20f   : > { %v1586_v49 = vadd.f32 %v1585_v40, %v1532_v12  ;;  %p1953_p5 = scmp.ne.s32.totalorder %s1628_s16, %s1952_s17  ;;  %p1959_p8 = scmp.lt.s32.totalorder %s1628_s16, %s1628_s16 }
 0x210   : > { %p1960_p9 = scmp.lt.s32.totalorder %s1958_s23, %s1952_s17 }
 0x211   : > { %1587 = vst.msk [vmem:[#allocation6] sm:$0x1] %vm1530_vm2, %v1586_v49  ;;  %p1954_p4 = pnand %p1953_p5, %p106_p2 }
 0x212   : > { %p1961_p10 = por %p1960_p9, %p1959_p8 }
 0x213   : > { %p1955_p7 = pneg %p1954_p4 }
 0x215   : > { %p1962_p11 = pnand %p1961_p10, %p1955_p7 }
 0x217   : > { %1965 = shalt.err (!%p1962_p11)
}
 0x218   : > { %s1966_s26 = scalar_lea.hbm %s3196_s5, 16 }
 0x219   : > { %p1967_p12 = scmp.ne.s32.totalorder %s3196_s5, %s1966_s26  ;;  %p1972_p1 = scmp.lt.u32.totalorder %s1966_s26, %s3196_s5 }
 0x21b   : > { %p1968_p13 = pnand %p1967_p12, %p106_p2 }
 0x21d   : > { %p1969_p0 = pneg %p1968_p13 }
 0x21f   : > { %p1974_p3 = pnand %p1972_p1, %p1969_p0 }
 0x221   : > { %1977 = shalt.err (!%p1974_p3)
}
 0x222   : > { %1843 = dma.vmem_to_hbm [thread:$0]  (%p106_p2), %s1628_s16, 16, %s3196_s5, [#allocation5]  }
 0x223   : > { %1995 = dma.done.wait (%p106_p2), [#allocation5], 32  }
 0x224   : > { %1997 = vsyncadd (%p106_p2), [#allocation5], 4294967264 }
 0x225 PF: > { %p1857_p5 = scmp.ge.s32.totalorder %s2016_s21, 2  ;;  %s1647_s11 = sand.u32 1, %s2004_s18  }
 0x226   : > { %s1648_s12 = scalar_lea.sflag [#allocation3], %s1647_s11 }
 0x227   : > { %p1850_p4 = pnand %p1857_p5, %p2099_p6 }
 0x229   : > { %1999 = dma.done.wait (!%p1850_p4), %s1648_s12, 2048  }
 0x22a   : > { %2001 = vsyncadd (!%p1850_p4), %s1648_s12, 4294965248  ;;  %p17_p7 = scmp.ge.s32.totalorder %s2080_s24, 4   ;;  %s3282_s18 = smov %s2008_s19 }
 0x22b   : > { %s3283_s19 = smov %s2012_s20  ;;  %s3284_s20 = smov %s2091_s27 }
 0x22c   : > { %s3285_s21 = smov %s2080_s24  ;;  %19 = sbr.rel (!%p17_p7) target bundleno = 4 (0x4), region = 97 }
 0x233   :  { %1653 = vsyncpa [#allocation3], 1 }
 0x234   :  { %1655 = vsyncpa [#allocation3 + $0x1], 1 }
 0x235   :  { %1656 = vsyncpa [#allocation5], 1 }

</bundles_post_ra>
